<compile_context>
chip_gen: v6e
topology: v6e:2x2x1
jax: 0.10.0
libtpu: 0.0.40
codegen_flags: <defaults>
</compile_context>

<pallas_src>
import functools

import jax
import jax.numpy as jnp
from jax.experimental import pallas as pl
from jax.experimental.pallas import tpu as pltpu


# ----------------------------- Pallas kernel --------------------------------
def _bisenet_head_kernel(p_ref, w3_ref, b3_ref, w1_ref, b1_ref, at_ref,
                         o_ref, lt_ref):
    # p_ref : (NB, H*W, Kp)    bf16 im2col patches (K zero-padded to Kp)
    # w3_ref: (Kp, Cm)         bf16 BN-folded 3x3 conv weights, im2col layout
    # b3_ref: (1, Cm)          f32 BN-folded bias
    # w1_ref: (Cm, Cp)         bf16 1x1 conv weights (classes padded to Cp)
    # b1_ref: (1, Cp)          f32 1x1 conv bias (zeros in padded classes)
    # at_ref: (H*W, col_blk)   bf16 column slice of kron(A_h, A_w)^T
    # o_ref : (NB, Cp, col_blk) f32 NCHW-flat, lane-dense output slice
    # lt_ref: (NB*Cp, H*W)     bf16 scratch: channels-major logits, persists
    #                          across the column-tile grid axis.
    NB, HW, _ = p_ref.shape
    Cp = w1_ref.shape[1]

    # Conv3x3(+BN)+ReLU and Conv1x1(+bias) are column-tile invariant:
    # compute once per batch block, keep channels-major in VMEM scratch.
    @pl.when(pl.program_id(1) == 0)
    def _():
        patches = p_ref[...].reshape(NB * HW, p_ref.shape[2])      # bf16
        fm = jnp.maximum(
            jnp.dot(patches, w3_ref[...],
                    preferred_element_type=jnp.float32) + b3_ref[0],
            0.0)                                                    # (NB*HW, Cm) f32
        logits = jnp.dot(fm.astype(jnp.bfloat16), w1_ref[...],
                         preferred_element_type=jnp.float32) + b1_ref[0]
        # Channels-major (tiny XLU transpose) so the upsample matmul emits a
        # lane-dense (Cp, col_blk) result straight into the NCHW output.
        lt = jnp.transpose(logits.reshape(NB, HW, Cp), (0, 2, 1))
        lt_ref[...] = lt.reshape(NB * Cp, HW).astype(lt_ref.dtype)

    # Fused bilinear upsample for this Ho*Wo column tile (one MXU matmul).
    out = jnp.dot(lt_ref[...], at_ref[...],
                  preferred_element_type=jnp.float32)               # (NB*Cp, col_blk)
    o_ref[...] = out.reshape(o_ref.shape).astype(o_ref.dtype)


# ------------------------------- helpers -------------------------------------
def _interp_matrix(out_size, in_size, dtype=jnp.float32):
    """(out_size, in_size) bilinear interpolation matrix, align_corners=True."""
    if out_size == 1:
        coord = jnp.zeros((1,), jnp.float32)
    else:
        coord = jnp.arange(out_size, dtype=jnp.float32) * (
            (in_size - 1) / (out_size - 1))
    idx = jnp.arange(in_size, dtype=jnp.float32)
    # Hat function: weight of input i for output o = max(0, 1 - |coord_o - i|).
    return jnp.maximum(0.0, 1.0 - jnp.abs(coord[:, None] - idx[None, :])).astype(dtype)


def _fused_upsample_matrix_T(Ho, Wo, H, W, dtype=jnp.float32):
    """kron(A_h, A_w)^T of shape (H*W, Ho*Wo): logits_T @ this == upsampled_T."""
    ah = _interp_matrix(Ho, H)       # (Ho, H)
    aw = _interp_matrix(Wo, W)       # (Wo, W)
    at = jnp.einsum('oh,pw->hwop', ah, aw).reshape(H * W, Ho * Wo)
    return at.astype(dtype)


def _default_batch_block(n_batch):
    """v7x has 2 TensorCores/chip: keep grid >= 2 there. On single-TC
    v5e/v6e fold the whole batch into one step (amortize ~0.35us/step and
    raise matmul M)."""
    try:
        kind = jax.devices()[0].device_kind.lower()
    except Exception:  # pragma: no cover - defensive
        kind = ""
    if ("v7" in kind or "tpu7" in kind) and n_batch >= 2:
        return max(1, n_batch // 2)
    return n_batch


def _pick_col_block(howo, target=4096):
    """Largest multiple-of-128 divisor of Ho*Wo that is <= target (bounds the
    per-step `at` slice to a few MiB in bf16); single tile if Ho*Wo is small."""
    if howo <= target:
        return howo
    for t in range(target, 127, -128):
        if howo % t == 0:
            return t
    return howo


# ------------------------------- wrapper -------------------------------------
@functools.partial(jax.jit, static_argnames=("size", "batch_block", "col_block"))
def bisenet_head_forward(x_nchw, w3_folded, b3_folded, w1, b1, size,
                         batch_block=None, col_block=None):
    """x_nchw: (N, Cin, H, W) f32 -> (N, Cout, Ho, Wo) f32.

    w3_folded: (3, 3, Cin, Cm) BN-folded conv3x3 weights (HWIO layout).
    batch_block: batch elements per grid step (None -> per-generation default).
    col_block: Ho*Wo columns per grid step (None -> auto, multiple of 128).
    """
    N, Cin, H, W = x_nchw.shape
    Cm, Cout = w1.shape
    Ho, Wo = size
    HW, HoWo = H * W, Ho * Wo

    nb = batch_block if batch_block is not None else _default_batch_block(N)
    assert N % nb == 0, "batch_block must divide N"
    cb = col_block if col_block is not None else _pick_col_block(HoWo)
    assert HoWo % cb == 0, "col_block must divide Ho*Wo"

    Cp = -(-Cout // 16) * 16        # pad classes to the bf16 (16,128) sublane tile
    K9 = 9 * Cin
    Kp = -(-K9 // 128) * 128        # pad im2col K to a lane-dense multiple of 128

    # NCHW -> NHWC + zero-pad halo for the 3x3 conv.
    # TODO(synk): at production sizes accept NHWC from the producer to avoid
    # this extra HBM round trip over the largest input.
    x_pad = jnp.pad(jnp.transpose(x_nchw, (0, 2, 3, 1)),
                    ((0, 0), (1, 1), (1, 1), (0, 0)))

    # Wrapper-side im2col: 9 static shifted views concatenated in (kh,kw,cin)
    # order (matches w3_folded.reshape(9*Cin, Cm) rows), K zero-padded, bf16.
    patches = jnp.concatenate(
        [x_pad[:, kh:kh + H, kw:kw + W, :] for kh in range(3) for kw in range(3)],
        axis=-1).reshape(N, HW, K9)
    patches = jnp.pad(patches, ((0, 0), (0, 0), (0, Kp - K9))).astype(jnp.bfloat16)

    w3_mat = jnp.pad(w3_folded.reshape(K9, Cm),
                     ((0, Kp - K9), (0, 0))).astype(jnp.bfloat16)
    b3_m = b3_folded.reshape(1, Cm).astype(jnp.float32)
    w1_p = jnp.pad(w1, ((0, 0), (0, Cp - Cout))).astype(jnp.bfloat16)
    b1_p = jnp.pad(b1, (0, Cp - Cout)).reshape(1, Cp).astype(jnp.float32)
    at = _fused_upsample_matrix_T(Ho, Wo, H, W).astype(jnp.bfloat16)
    # TODO(synk): beyond a few MiB, replace the fused `at` with the separable
    # two-stage upsample, and single-buffer the grid-invariant operands
    # (pipeline_mode=pl.Buffered(1)) to halve their VMEM footprint on v7x.

    out_flat = pl.pallas_call(
        _bisenet_head_kernel,
        out_shape=jax.ShapeDtypeStruct((N, Cp, HoWo), jnp.float32),
        grid_spec=pltpu.PrefetchScalarGridSpec(
            num_scalar_prefetch=0,
            grid=(N // nb, HoWo // cb),
            in_specs=[
                pl.BlockSpec((nb, HW, Kp), lambda b, j: (b, 0, 0)),
                pl.BlockSpec((Kp, Cm), lambda b, j: (0, 0)),
                pl.BlockSpec((1, Cm), lambda b, j: (0, 0)),
                pl.BlockSpec((Cm, Cp), lambda b, j: (0, 0)),
                pl.BlockSpec((1, Cp), lambda b, j: (0, 0)),
                pl.BlockSpec((HW, cb), lambda b, j: (0, j)),
            ],
            out_specs=pl.BlockSpec((nb, Cp, cb), lambda b, j: (b, 0, j)),
            scratch_shapes=[pltpu.VMEM((nb * Cp, HW), jnp.bfloat16)],
        ),
        compiler_params=pltpu.CompilerParams(
            # batch axis parallel (megacore on v7x); column axis carries the
            # logits scratch so it must be sequential.
            dimension_semantics=("parallel", "arbitrary")),
    )(patches, w3_mat, b3_m, w1_p, b1_p, at)

    # Slice off padded classes; reshape is free (no output transpose).
    return out_flat[:, :Cout, :].reshape(N, Cout, Ho, Wo)


# --------------------------- pure-JAX reference -------------------------------
def _reference(x_nchw, w3_folded, b3_folded, w1, b1, size):
    N, Cin, H, W = x_nchw.shape
    Cm = w3_folded.shape[-1]
    Ho, Wo = size
    x_pad = jnp.pad(jnp.transpose(x_nchw, (0, 2, 3, 1)),
                    ((0, 0), (1, 1), (1, 1), (0, 0)))
    acc = jnp.zeros((N, H, W, Cm), jnp.float32)
    for kh in range(3):
        for kw in range(3):
            acc = acc + jnp.einsum('nhwc,cm->nhwm',
                                   x_pad[:, kh:kh + H, kw:kw + W, :],
                                   w3_folded[kh, kw])
    fm = jnp.maximum(acc + b3_folded, 0.0)
    logits = jnp.einsum('nhwm,mc->nhwc', fm, w1) + b1
    ah = _interp_matrix(Ho, H)
    aw = _interp_matrix(Wo, W)
    out = jnp.einsum('oh,nhwc->nowc', ah, logits)
    out = jnp.einsum('pw,nowc->nopc', aw, out)
    return jnp.transpose(out, (0, 3, 1, 2))


# --------------------------------- main ---------------------------------------
if __name__ == "__main__":
    # Small shapes consistent with the module: is_aux=False -> mid channels 64.
    N, Cin, H, W = 2, 4, 16, 16
    Cm = 64          # conv_3x3 out channels (non-aux head)
    Cout = 5         # out_planes (num classes)
    size = (32, 32)  # interpolate target size

    key = jax.random.PRNGKey(0)
    k = jax.random.split(key, 8)

    x = jax.random.normal(k[0], (N, Cin, H, W), jnp.float32)

    # PyTorch conv weight layout (Cout, Cin, kh, kw); BN (eval) folded in.
    w3_torch = jax.random.normal(k[1], (Cm, Cin, 3, 3), jnp.float32) * 0.1
    gamma = 1.0 + 0.1 * jax.random.normal(k[2], (Cm,), jnp.float32)
    beta = 0.1 * jax.random.normal(k[3], (Cm,), jnp.float32)
    run_mean = 0.1 * jax.random.normal(k[4], (Cm,), jnp.float32)
    run_var = jnp.abs(jax.random.normal(k[5], (Cm,), jnp.float32)) + 0.5
    eps = 1e-5
    scale = gamma / jnp.sqrt(run_var + eps)                       # (Cm,)
    w3_folded_torch = w3_torch * scale[:, None, None, None]
    b3_folded = beta - run_mean * scale
    # (Cout, Cin, kh, kw) -> (kh, kw, Cin, Cout) for the NHWC im2col kernel.
    w3_folded = jnp.transpose(w3_folded_torch, (2, 3, 1, 0))

    w1_torch = jax.random.normal(k[6], (Cout, Cm, 1, 1), jnp.float32) * 0.1
    w1 = jnp.transpose(w1_torch[:, :, 0, 0], (1, 0))              # (Cm, Cout)
    b1 = 0.1 * jax.random.normal(k[7], (Cout,), jnp.float32)

    out = bisenet_head_forward(x, w3_folded, b3_folded, w1, b1, size)
    out = jax.block_until_ready(out)

    ref = _reference(x, w3_folded, b3_folded, w1, b1, size)
    assert out.shape == (N, Cout, size[0], size[1])
    # bf16 MXU operands (f32 accumulation) vs. f32 reference: loosened tolerance.
    assert jnp.allclose(out, ref, atol=5e-2, rtol=5e-2)

    print("KERNEL_OK")
</pallas_src>

<mosaic_0001>
module attributes {stable_mosaic.version = 11 : i64} {
  func.func @_bisenet_head_kernel(%arg0: i32, %arg1: i32, %arg2: memref<2x256x128xbf16, #tpu.memory_space<vmem>>, %arg3: memref<128x64xbf16, #tpu.memory_space<vmem>>, %arg4: memref<1x64xf32, #tpu.memory_space<vmem>>, %arg5: memref<64x16xbf16, #tpu.memory_space<vmem>>, %arg6: memref<1x16xf32, #tpu.memory_space<vmem>>, %arg7: memref<256x1024xbf16, #tpu.memory_space<vmem>>, %arg8: memref<2x16x1024xf32, #tpu.memory_space<vmem>>, %arg9: memref<32x256xbf16, #tpu.memory_space<vmem>>) attributes {dimension_semantics = [#tpu.dimension_semantics<parallel>, #tpu.dimension_semantics<arbitrary>], iteration_bounds = array<i64: 1, 1>, scalar_prefetch = 0 : i64, scratch_operands = 1 : i64, tpu.core_type = #tpu.core_type<tc>, window_params = [{transform_indices = @transform_0, window_bounds = array<i64: 2, 256, 128>}, {pipeline_mode = #tpu.pipeline_mode<synchronous>, transform_indices = @transform_1, window_bounds = array<i64: 128, 64>}, {pipeline_mode = #tpu.pipeline_mode<synchronous>, transform_indices = @transform_2, window_bounds = array<i64: 1, 64>}, {pipeline_mode = #tpu.pipeline_mode<synchronous>, transform_indices = @transform_3, window_bounds = array<i64: 64, 16>}, {pipeline_mode = #tpu.pipeline_mode<synchronous>, transform_indices = @transform_4, window_bounds = array<i64: 1, 16>}, {transform_indices = @transform_5, window_bounds = array<i64: 256, 1024>}, {transform_indices = @transform_6, window_bounds = array<i64: 2, 16, 1024>}]} {
    %c0_i32 = arith.constant 0 : i32
    %0 = arith.cmpi eq, %arg1, %c0_i32 : i32
    %1 = arith.extui %0 : i1 to i32
    %c0_i32_0 = arith.constant 0 : i32
    %2 = arith.cmpi ne, %1, %c0_i32_0 : i32
    scf.if %2 {
      %c0_7 = arith.constant 0 : index
      %c0_8 = arith.constant 0 : index
      %c0_9 = arith.constant 0 : index
      %8 = vector.load %arg2[%c0_7, %c0_8, %c0_9] : memref<2x256x128xbf16, #tpu.memory_space<vmem>>, vector<2x256x128xbf16>
      %9 = vector.shape_cast %8 : vector<2x256x128xbf16> to vector<512x128xbf16>
      %c0_10 = arith.constant 0 : index
      %c0_11 = arith.constant 0 : index
      %10 = vector.load %arg3[%c0_10, %c0_11] : memref<128x64xbf16, #tpu.memory_space<vmem>>, vector<128x64xbf16>
      %cst_12 = arith.constant dense<0.000000e+00> : vector<512x64xf32>
      %11 = tpu.matmul %9, %10, %cst_12 {dimension_numbers = #tpu.dot_dimension_numbers<[1], [0], [0], [1], [0, 0, 1, 1], [], []>} : vector<512x128xbf16>, vector<128x64xbf16>, vector<512x64xf32> -> vector<512x64xf32>
      %c0_13 = arith.constant 0 : index
      %c0_14 = arith.constant 0 : index
      %12 = vector.load %arg4[%c0_13, %c0_14] : memref<1x64xf32, #tpu.memory_space<vmem>>, vector<1x64xf32>
      %13 = vector.shape_cast %12 : vector<1x64xf32> to vector<64xf32>
      %14 = vector.shape_cast %13 : vector<64xf32> to vector<1x64xf32>
      %15 = vector.broadcast %14 : vector<1x64xf32> to vector<512x64xf32>
      %16 = arith.addf %11, %15 : vector<512x64xf32>
      %cst_15 = arith.constant 0.000000e+00 : f32
      %17 = vector.broadcast %cst_15 : f32 to vector<512x64xf32>
      %18 = arith.maximumf %16, %17 : vector<512x64xf32>
      %19 = arith.truncf %18 : vector<512x64xf32> to vector<512x64xbf16>
      %c0_16 = arith.constant 0 : index
      %c0_17 = arith.constant 0 : index
      %20 = vector.load %arg5[%c0_16, %c0_17] : memref<64x16xbf16, #tpu.memory_space<vmem>>, vector<64x16xbf16>
      %cst_18 = arith.constant dense<0.000000e+00> : vector<512x16xf32>
      %21 = tpu.matmul %19, %20, %cst_18 {dimension_numbers = #tpu.dot_dimension_numbers<[1], [0], [0], [1], [0, 0, 1, 1], [], []>} : vector<512x64xbf16>, vector<64x16xbf16>, vector<512x16xf32> -> vector<512x16xf32>
      %c0_19 = arith.constant 0 : index
      %c0_20 = arith.constant 0 : index
      %22 = vector.load %arg6[%c0_19, %c0_20] : memref<1x16xf32, #tpu.memory_space<vmem>>, vector<1x16xf32>
      %23 = vector.shape_cast %22 : vector<1x16xf32> to vector<16xf32>
      %24 = vector.shape_cast %23 : vector<16xf32> to vector<1x16xf32>
      %25 = vector.broadcast %24 : vector<1x16xf32> to vector<512x16xf32>
      %26 = arith.addf %21, %25 : vector<512x16xf32>
      %27 = vector.shape_cast %26 : vector<512x16xf32> to vector<2x256x16xf32>
      %28 = tpu.transpose %27, [0, 2, 1] : vector<2x256x16xf32> -> vector<2x16x256xf32>
      %29 = vector.shape_cast %28 : vector<2x16x256xf32> to vector<32x256xf32>
      %30 = arith.truncf %29 : vector<32x256xf32> to vector<32x256xbf16>
      %c0_21 = arith.constant 0 : index
      %c0_22 = arith.constant 0 : index
      %31 = vector.load %arg9[%c0_21, %c0_22] : memref<32x256xbf16, #tpu.memory_space<vmem>>, vector<32x256xbf16>
      tpu.vector_store %arg9[%c0_21, %c0_22], %30 {strides = array<i32>} : memref<32x256xbf16, #tpu.memory_space<vmem>>, vector<32x256xbf16>,
    } else {
    }
    %c0 = arith.constant 0 : index
    %c0_1 = arith.constant 0 : index
    %3 = vector.load %arg9[%c0, %c0_1] : memref<32x256xbf16, #tpu.memory_space<vmem>>, vector<32x256xbf16>
    %c0_2 = arith.constant 0 : index
    %c0_3 = arith.constant 0 : index
    %4 = vector.load %arg7[%c0_2, %c0_3] : memref<256x1024xbf16, #tpu.memory_space<vmem>>, vector<256x1024xbf16>
    %cst = arith.constant dense<0.000000e+00> : vector<32x1024xf32>
    %5 = tpu.matmul %3, %4, %cst {dimension_numbers = #tpu.dot_dimension_numbers<[1], [0], [0], [1], [0, 0, 1, 1], [], []>} : vector<32x256xbf16>, vector<256x1024xbf16>, vector<32x1024xf32> -> vector<32x1024xf32>
    %6 = vector.shape_cast %5 : vector<32x1024xf32> to vector<2x16x1024xf32>
    %c0_4 = arith.constant 0 : index
    %c0_5 = arith.constant 0 : index
    %c0_6 = arith.constant 0 : index
    %7 = vector.load %arg8[%c0_4, %c0_5, %c0_6] : memref<2x16x1024xf32, #tpu.memory_space<vmem>>, vector<2x16x1024xf32>
    tpu.vector_store %arg8[%c0_4, %c0_5, %c0_6], %6 {strides = array<i32>} : memref<2x16x1024xf32, #tpu.memory_space<vmem>>, vector<2x16x1024xf32>,
    return
  }
  func.func @transform_0(%arg0: i32, %arg1: i32) -> (i32, i32, i32) {
    %c0_i32 = arith.constant 0 : i32
    %c0_i32_0 = arith.constant 0 : i32
    %c0_i32_1 = arith.constant 0 : i32
    return %arg0, %c0_i32, %c0_i32_0 : i32, i32, i32
  }
  func.func @transform_1(%arg0: i32, %arg1: i32) -> (i32, i32) {
    %c0_i32 = arith.constant 0 : i32
    %c0_i32_0 = arith.constant 0 : i32
    %c0_i32_1 = arith.constant 0 : i32
    return %c0_i32, %c0_i32_0 : i32, i32
  }
  func.func @transform_2(%arg0: i32, %arg1: i32) -> (i32, i32) {
    %c0_i32 = arith.constant 0 : i32
    %c0_i32_0 = arith.constant 0 : i32
    %c0_i32_1 = arith.constant 0 : i32
    return %c0_i32, %c0_i32_0 : i32, i32
  }
  func.func @transform_3(%arg0: i32, %arg1: i32) -> (i32, i32) {
    %c0_i32 = arith.constant 0 : i32
    %c0_i32_0 = arith.constant 0 : i32
    %c0_i32_1 = arith.constant 0 : i32
    return %c0_i32, %c0_i32_0 : i32, i32
  }
  func.func @transform_4(%arg0: i32, %arg1: i32) -> (i32, i32) {
    %c0_i32 = arith.constant 0 : i32
    %c0_i32_0 = arith.constant 0 : i32
    %c0_i32_1 = arith.constant 0 : i32
    return %c0_i32, %c0_i32_0 : i32, i32
  }
  func.func @transform_5(%arg0: i32, %arg1: i32) -> (i32, i32) {
    %c0_i32 = arith.constant 0 : i32
    %c0_i32_0 = arith.constant 0 : i32
    return %c0_i32, %arg1 : i32, i32
  }
  func.func @transform_6(%arg0: i32, %arg1: i32) -> (i32, i32, i32) {
    %c0_i32 = arith.constant 0 : i32
    %c0_i32_0 = arith.constant 0 : i32
    return %arg0, %c0_i32, %arg1 : i32, i32, i32
  }
}

</mosaic_0001>

<bundles_post_ra>
// kernel: bisenet_head_forward.1
= control target key start
LH: loop header
LB: loop body
LE: loop exit
PB: predicated region body
PF: predicated region fallthrough
CT: control target
= control target key end

     0   :  { %vm779_vm0 = vcmask 523264   ;;  %s3874_s1 = inlined_call_operand.vmem [shape: bf16[128,64], index: 1, kind: input, shape index: {}]   ;;  %s3875_s0 = inlined_call_operand.vmem [shape: bf16[2,256,128], index: 0, kind: input, shape index: {}]   ;;  %s3876_s3 = inlined_call_operand.vmem [shape: bf16[64,16], index: 3, kind: input, shape index: {}]   ;;  %s3877_s2 = inlined_call_operand.vmem [shape: f32[1,64], index: 2, kind: input, shape index: {}]   ;;  %s3878_s5 = inlined_call_operand.vmem [shape: bf16[256,1024], index: 5, kind: input, shape index: {}]   ;;  %s3879_s4 = inlined_call_operand.vmem [shape: f32[1,16], index: 4, kind: input, shape index: {}]   ;;  %s3880_s6 = inlined_call_operand.vmem [shape: f32[2,16,1024], index: 6, kind: output, shape index: {}]  }
   0x1   :  { %v2895_v0 = vld [vmem:[%s3874_s1 + $0x38] sm:$0xff]   ;;  %v2896_v1 = vld [vmem:[%s3874_s1 + $0x30] sm:$0xff]   ;;  %v2897_v2 = vld [vmem:[%s3874_s1 + $0x28] sm:$0xff]  }
   0x2   :  { %2659 = vmatprep.subr.bf16.mxu0 %v2895_v0  ;;  %v2898_v3 = vld [vmem:[%s3874_s1 + $0x20] sm:$0xff]   ;;  %v2899_v5 = vld [vmem:[%s3874_s1 + $0x18] sm:$0xff]   ;;  %v2900_v6 = vld [vmem:[%s3874_s1 + $0x10] sm:$0xff]  }
   0x3   :  { %2660 = vmatpush3.bf16.msra.mxu0 %v2895_v0  ;;  %v2903_v4 = vld [vmem:[%s3875_s0] sm:$0xff]   ;;  %v2901_v7 = vld [vmem:[%s3874_s1 + $0x8] sm:$0xff]   ;;  %v2905_v10 = vld [vmem:[%s3875_s0 + $0x10] sm:$0xff]  }
   0x4   :  { %2661 = vmatprep.subr.bf16.mxu0 %v2896_v1  ;;  %2675 = vmatprep.mubr.bf16.mxu0 %v2903_v4  ;;  %v2902_v8 = vld [vmem:[%s3874_s1] sm:$0xff]   ;;  %v2904_v9 = vld [vmem:[%s3875_s0 + $0x8] sm:$0xff]   ;;  %v2906_v11 = vld [vmem:[%s3875_s0 + $0x18] sm:$0xff]  }
   0x5   :  { %v2907_v12 = vld [vmem:[%s3875_s0 + $0x20] sm:$0xff]   ;;  %v2935_v13 = vld [vmem:[%s3876_s3 + $0x18] sm:$0xff]   ;;  %v2908_v14 = vld [vmem:[%s3875_s0 + $0x28] sm:$0xff]  }
   0x6   :  { %2739 = vmatprep.subr.bf16.mxu1 %v2935_v13  ;;  %v2909_v15 = vld [vmem:[%s3875_s0 + $0x30] sm:$0xff]   ;;  %v2910_v16 = vld [vmem:[%s3875_s0 + $0x38] sm:$0xff]   ;;  %v2911_v17 = vld [vmem:[%s3875_s0 + $0x40] sm:$0xff]  }
   0x7   :  { %2662 = vmatpush3.bf16.msra.mxu0 %v2896_v1  ;;  %2740 = vmatpush3.bf16.msra.mxu1 %v2935_v13  ;;  %v2912_v18 = vld [vmem:[%s3875_s0 + $0x48] sm:$0xff]   ;;  %v2913_v19 = vld [vmem:[%s3875_s0 + $0x50] sm:$0xff]   ;;  %v2914_v20 = vld [vmem:[%s3875_s0 + $0x58] sm:$0xff]  }
   0x8   :  { %2663 = vmatprep.subr.bf16.mxu0 %v2897_v2  ;;  %v2915_v21 = vld [vmem:[%s3875_s0 + $0x60] sm:$0xff]   ;;  %v2916_v22 = vld [vmem:[%s3875_s0 + $0x68] sm:$0xff]   ;;  %v2917_v23 = vld [vmem:[%s3875_s0 + $0x70] sm:$0xff]  }
   0x9   :  { %v2918_v24 = vld [vmem:[%s3875_s0 + $0x78] sm:$0xff]   ;;  %v2919_v25 = vld [vmem:[%s3875_s0 + $0x80] sm:$0xff]   ;;  %v2920_v26 = vld [vmem:[%s3875_s0 + $0x88] sm:$0xff]  }
   0xa   :  { %v2921_v27 = vld [vmem:[%s3875_s0 + $0x90] sm:$0xff]   ;;  %v2922_v29 = vld [vmem:[%s3875_s0 + $0x98] sm:$0xff]   ;;  %v2937_v30 = vld [vmem:[%s3876_s3 + $0x8] sm:$0xff]  }
   0xb   :  { %2664 = vmatpush3.bf16.msra.mxu0 %v2897_v2  ;;  %v2936_v28 = vld [vmem:[%s3876_s3 + $0x10] sm:$0xff]   ;;  %v2923_v31 = vld [vmem:[%s3875_s0 + $0xa0] sm:$0xff]   ;;  %v2924_v33 = vld [vmem:[%s3875_s0 + $0xa8] sm:$0xff]  }
   0xc   :  { %2665 = vmatprep.subr.bf16.mxu0 %v2898_v3  ;;  %2741 = vmatprep.subr.bf16.mxu1 %v2936_v28  ;;  %v2938_v32 = vld [vmem:[%s3876_s3] sm:$0xff]   ;;  %v2925_v34 = vld [vmem:[%s3875_s0 + $0xb0] sm:$0xff]   ;;  %v2926_v35 = vld [vmem:[%s3875_s0 + $0xb8] sm:$0xff]  }
   0xd   :  { %2742 = vmatpush3.bf16.msra.mxu1 %v2936_v28  ;;  %v2927_v36 = vld [vmem:[%s3875_s0 + $0xc0] sm:$0xff]   ;;  %v2928_v37 = vld [vmem:[%s3875_s0 + $0xc8] sm:$0xff]   ;;  %v2929_v38 = vld [vmem:[%s3875_s0 + $0xd0] sm:$0xff]  }
   0xe   :  { %2743 = vmatprep.subr.bf16.mxu1 %v2937_v30  ;;  %v2930_v39 = vld [vmem:[%s3875_s0 + $0xd8] sm:$0xff]   ;;  %v2931_v40 = vld [vmem:[%s3875_s0 + $0xe0] sm:$0xff]   ;;  %v2932_v41 = vld [vmem:[%s3875_s0 + $0xe8] sm:$0xff]  }
   0xf   :  { %2666 = vmatpush3.bf16.msra.mxu0 %v2898_v3  ;;  %v2933_v42 = vld [vmem:[%s3875_s0 + $0xf0] sm:$0xff]   ;;  %v2934_v43 = vld [vmem:[%s3875_s0 + $0xf8] sm:$0xff]   ;;  %v3109_v46 = vld [vmem:[%s3877_s2] ss:$0 sm:$0xff] }
  0x10   :  { %2667 = vmatprep.subr.bf16.mxu0 %v2899_v5 }
  0x11   :  { %2744 = vmatpush3.bf16.msra.mxu1 %v2937_v30 }
  0x12   :  { %2745 = vmatprep.subr.bf16.mxu1 %v2938_v32 }
  0x13   :  { %2668 = vmatpush3.bf16.msra.mxu0 %v2899_v5 }
  0x14   :  { %2669 = vmatprep.subr.bf16.mxu0 %v2900_v6 }
  0x15   :  { %2746 = vmatpush3.bf16.msra.mxu1 %v2938_v32 }
  0x17   :  { %2670 = vmatpush3.bf16.msra.mxu0 %v2900_v6 }
  0x18   :  { %2671 = vmatprep.subr.bf16.mxu0 %v2901_v7 }
  0x1b   :  { %2672 = vmatpush3.bf16.msra.mxu0 %v2901_v7 }
  0x1c   :  { %2673 = vmatprep.subr.bf16.mxu0 %v2902_v8 }
  0x1f   :  { %2674 = vmatpush3.bf16.msra.mxu0 %v2902_v8 }
  0x22   :  { %2676 = vmatmul.mubr.bf16.vlgmr.msra.gmra.mxu0 %v2904_v9 }
  0x23   :  { %2679 = vmatprep.mubr.bf16.mxu0 %v2905_v10 }
  0x2a   :  { %2680 = vmatmul.mubr.bf16.gmra.mxu0 %v2906_v11 }
  0x2b   :  { %2683 = vmatprep.mubr.bf16.mxu0 %v2907_v12 }
  0x32   :  { %2684 = vmatmul.mubr.bf16.gmra.mxu0 %v2908_v14 }
  0x33   :  { %2687 = vmatprep.mubr.bf16.mxu0 %v2909_v15 }
  0x3a   :  { %2688 = vmatmul.mubr.bf16.gmra.mxu0 %v2910_v16 }
  0x3b   :  { %2691 = vmatprep.mubr.bf16.mxu0 %v2911_v17 }
  0x42   :  { %2692 = vmatmul.mubr.bf16.gmra.mxu0 %v2912_v18 }
  0x43   :  { %2695 = vmatprep.mubr.bf16.mxu0 %v2913_v19 }
  0x4a   :  { %2696 = vmatmul.mubr.bf16.gmra.mxu0 %v2914_v20 }
  0x4b   :  { %2699 = vmatprep.mubr.bf16.mxu0 %v2915_v21 }
  0x52   :  { %2700 = vmatmul.mubr.bf16.gmra.mxu0 %v2916_v22 }
  0x53   :  { %2703 = vmatprep.mubr.bf16.mxu0 %v2917_v23 }
  0x5a   :  { %2704 = vmatmul.mubr.bf16.gmra.mxu0 %v2918_v24 }
  0x5b   :  { %2707 = vmatprep.mubr.bf16.mxu0 %v2919_v25 }
  0x62   :  { %2708 = vmatmul.mubr.bf16.gmra.mxu0 %v2920_v26 }
  0x63   :  { %2711 = vmatprep.mubr.bf16.mxu0 %v2921_v27 }
  0x6a   :  { %2712 = vmatmul.mubr.bf16.gmra.mxu0 %v2922_v29 }
  0x6b   :  { %2715 = vmatprep.mubr.bf16.mxu0 %v2923_v31 }
  0x72   :  { %2716 = vmatmul.mubr.bf16.gmra.mxu0 %v2924_v33 }
  0x73   :  { %2719 = vmatprep.mubr.bf16.mxu0 %v2925_v34 }
  0x7a   :  { %2720 = vmatmul.mubr.bf16.gmra.mxu0 %v2926_v35 }
  0x7b   :  { %2723 = vmatprep.mubr.bf16.mxu0 %v2927_v36 }
  0x82   :  { %2724 = vmatmul.mubr.bf16.gmra.mxu0 %v2928_v37 }
  0x83   :  { %2727 = vmatprep.mubr.bf16.mxu0 %v2929_v38 }
  0x8a   :  { %2728 = vmatmul.mubr.bf16.gmra.mxu0 %v2930_v39 }
  0x8b   :  { %2731 = vmatprep.mubr.bf16.mxu0 %v2931_v40 }
  0x92   :  { %2732 = vmatmul.mubr.bf16.gmra.mxu0 %v2932_v41 }
  0x93   :  { %2735 = vmatprep.mubr.bf16.mxu0 %v2933_v42 }
  0x9a   :  { %2736 = vmatmul.mubr.bf16.gmra.mxu0 %v2934_v43 }
  0xe2   :  { %v2677_v44 = vpop.f32.mrf.mxu0 }
  0xe3   :  { %v398_v50 = vadd.f32 %v2677_v44, %v3109_v46 }
  0xe4   :  { %v389_v45 = vpop.f32.mrf.mxu0 }
  0xe5   :  { %v390_v48 = vadd.f32 %v3109_v46, %v389_v45  ;;  %v646_v57 = vmax.f32 %v398_v50, 0.0 }
  0xe6   :  { %v2678_v47 = vpop.f32.mrf.mxu0 }
  0xe7   :  { %v401_v49 = vadd.f32 %v2678_v47, %v3109_v46  ;;  %v644_v55 = vmax.f32 %v390_v48, 0.0 }
  0xe8   :  { %v392_v51 = vpop.f32.mrf.mxu0 }
  0xe9   :  { %v393_v52 = vadd.f32 %v3109_v46, %v392_v51  ;;  %v647_v53 = vmax.f32 %v401_v49, 0.0 }
  0xea   :  { %v2681_v54 = vpop.f32.mrf.mxu0 }
  0xeb   :  { %v645_v56 = vmax.f32 %v393_v52, 0.0  ;;  %v709_v60 = vpack.c.bf16 %v647_v53, %v646_v57  ;;  %v414_v0 = vadd.f32 %v2681_v54, %v3109_v46 }
  0xec   :  { %v405_v58 = vpop.f32.mrf.mxu0 }
  0xed   :  { %v708_v59 = vpack.c.bf16 %v645_v56, %v644_v55  ;;  %v406_v62 = vadd.f32 %v3109_v46, %v405_v58  ;;  %v650_v7 = vmax.f32 %v414_v0, 0.0 }
  0xee   :  { %v2682_v61 = vpop.f32.mrf.mxu0 }
  0xef   :  { %v417_v63 = vadd.f32 %v2682_v61, %v3109_v46  ;;  %2747 = vmatprep.mubr.msk.bf16.mxu1 %vm779_vm0, %v708_v59  ;;  %v648_v5 = vmax.f32 %v406_v62, 0.0 }
  0xf0   :  { %v408_v1 = vpop.f32.mrf.mxu0  ;;  %2748 = vmatmul.mubr.msk.bf16.vlgmr.msra.gmra.mxu1 %vm779_vm0, %v709_v60 }
  0xf1   :  { %v409_v2 = vadd.f32 %v3109_v46, %v408_v1  ;;  %v651_v3 = vmax.f32 %v417_v63, 0.0 }
  0xf2   :  { %v2685_v4 = vpop.f32.mrf.mxu0 }
  0xf3   :  { %v649_v6 = vmax.f32 %v409_v2, 0.0  ;;  %v711_v10 = vpack.c.bf16 %v651_v3, %v650_v7  ;;  %v430_v14 = vadd.f32 %v2685_v4, %v3109_v46 }
  0xf4   :  { %v421_v8 = vpop.f32.mrf.mxu0 }
  0xf5   :  { %v710_v9 = vpack.c.bf16 %v649_v6, %v648_v5  ;;  %v422_v12 = vadd.f32 %v3109_v46, %v421_v8  ;;  %v654_v21 = vmax.f32 %v430_v14, 0.0 }
  0xf6   :  { %v2686_v11 = vpop.f32.mrf.mxu0 }
  0xf7   :  { %v433_v13 = vadd.f32 %v2686_v11, %v3109_v46  ;;  %2751 = vmatprep.mubr.msk.bf16.mxu1 %vm779_vm0, %v710_v9  ;;  %v652_v19 = vmax.f32 %v422_v12, 0.0 }
  0xf8   :  { %v424_v15 = vpop.f32.mrf.mxu0  ;;  %2752 = vmatmul.mubr.msk.bf16.gmra.mxu1 %vm779_vm0, %v711_v10 }
  0xf9   :  { %v425_v16 = vadd.f32 %v3109_v46, %v424_v15  ;;  %v655_v17 = vmax.f32 %v433_v13, 0.0 }
  0xfa   :  { %v2689_v18 = vpop.f32.mrf.mxu0 }
  0xfb   :  { %v653_v20 = vmax.f32 %v425_v16, 0.0  ;;  %v713_v24 = vpack.c.bf16 %v655_v17, %v654_v21  ;;  %v446_v28 = vadd.f32 %v2689_v18, %v3109_v46 }
  0xfc   :  { %v437_v22 = vpop.f32.mrf.mxu0 }
  0xfd   :  { %v712_v23 = vpack.c.bf16 %v653_v20, %v652_v19  ;;  %v438_v26 = vadd.f32 %v3109_v46, %v437_v22  ;;  %v658_v35 = vmax.f32 %v446_v28, 0.0 }
  0xfe   :  { %v2690_v25 = vpop.f32.mrf.mxu0 }
  0xff   :  { %v449_v27 = vadd.f32 %v2690_v25, %v3109_v46  ;;  %2755 = vmatprep.mubr.msk.bf16.mxu1 %vm779_vm0, %v712_v23  ;;  %v656_v33 = vmax.f32 %v438_v26, 0.0 }
 0x100   :  { %v440_v29 = vpop.f32.mrf.mxu0  ;;  %2756 = vmatmul.mubr.msk.bf16.gmra.mxu1 %vm779_vm0, %v713_v24 }
 0x101   :  { %v441_v30 = vadd.f32 %v3109_v46, %v440_v29  ;;  %v659_v31 = vmax.f32 %v449_v27, 0.0 }
 0x102   :  { %v2693_v32 = vpop.f32.mrf.mxu0 }
 0x103   :  { %v657_v34 = vmax.f32 %v441_v30, 0.0  ;;  %v715_v38 = vpack.c.bf16 %v659_v31, %v658_v35  ;;  %v462_v42 = vadd.f32 %v2693_v32, %v3109_v46 }
 0x104   :  { %v453_v36 = vpop.f32.mrf.mxu0 }
 0x105   :  { %v714_v37 = vpack.c.bf16 %v657_v34, %v656_v33  ;;  %v454_v40 = vadd.f32 %v3109_v46, %v453_v36  ;;  %v662_v50 = vmax.f32 %v462_v42, 0.0 }
 0x106   :  { %v2694_v39 = vpop.f32.mrf.mxu0 }
 0x107   :  { %v465_v41 = vadd.f32 %v2694_v39, %v3109_v46  ;;  %2759 = vmatprep.mubr.msk.bf16.mxu1 %vm779_vm0, %v714_v37  ;;  %v660_v48 = vmax.f32 %v454_v40, 0.0 }
 0x108   :  { %v456_v43 = vpop.f32.mrf.mxu0  ;;  %2760 = vmatmul.mubr.msk.bf16.gmra.mxu1 %vm779_vm0, %v715_v38 }
 0x109   :  { %v457_v44 = vadd.f32 %v3109_v46, %v456_v43  ;;  %v663_v45 = vmax.f32 %v465_v41, 0.0 }
 0x10a   :  { %v2697_v47 = vpop.f32.mrf.mxu0 }
 0x10b   :  { %v661_v49 = vmax.f32 %v457_v44, 0.0  ;;  %v717_v53 = vpack.c.bf16 %v663_v45, %v662_v50  ;;  %v478_v57 = vadd.f32 %v2697_v47, %v3109_v46 }
 0x10c   :  { %v469_v51 = vpop.f32.mrf.mxu0 }
 0x10d   :  { %v716_v52 = vpack.c.bf16 %v661_v49, %v660_v48  ;;  %v470_v55 = vadd.f32 %v3109_v46, %v469_v51  ;;  %v666_v0 = vmax.f32 %v478_v57, 0.0 }
 0x10e   :  { %v2698_v54 = vpop.f32.mrf.mxu0 }
 0x10f   :  { %v481_v56 = vadd.f32 %v2698_v54, %v3109_v46  ;;  %2763 = vmatprep.mubr.msk.bf16.mxu1 %vm779_vm0, %v716_v52  ;;  %v664_v62 = vmax.f32 %v470_v55, 0.0 }
 0x110   :  { %v472_v58 = vpop.f32.mrf.mxu0  ;;  %2764 = vmatmul.mubr.msk.bf16.gmra.mxu1 %vm779_vm0, %v717_v53 }
 0x111   :  { %v473_v59 = vadd.f32 %v3109_v46, %v472_v58  ;;  %v667_v60 = vmax.f32 %v481_v56, 0.0 }
 0x112   :  { %v2701_v61 = vpop.f32.mrf.mxu0 }
 0x113   :  { %v665_v63 = vmax.f32 %v473_v59, 0.0  ;;  %v719_v3 = vpack.c.bf16 %v667_v60, %v666_v0  ;;  %v494_v7 = vadd.f32 %v2701_v61, %v3109_v46 }
 0x114   :  { %v485_v1 = vpop.f32.mrf.mxu0 }
 0x115   :  { %v718_v2 = vpack.c.bf16 %v665_v63, %v664_v62  ;;  %v486_v5 = vadd.f32 %v3109_v46, %v485_v1  ;;  %v670_v14 = vmax.f32 %v494_v7, 0.0 }
 0x116   :  { %v2702_v4 = vpop.f32.mrf.mxu0 }
 0x117   :  { %v497_v6 = vadd.f32 %v2702_v4, %v3109_v46  ;;  %2767 = vmatprep.mubr.msk.bf16.mxu1 %vm779_vm0, %v718_v2  ;;  %v668_v12 = vmax.f32 %v486_v5, 0.0 }
 0x118   :  { %v488_v8 = vpop.f32.mrf.mxu0  ;;  %2768 = vmatmul.mubr.msk.bf16.gmra.mxu1 %vm779_vm0, %v719_v3 }
 0x119   :  { %v489_v9 = vadd.f32 %v3109_v46, %v488_v8  ;;  %v671_v10 = vmax.f32 %v497_v6, 0.0 }
 0x11a   :  { %v2705_v11 = vpop.f32.mrf.mxu0 }
 0x11b   :  { %v669_v13 = vmax.f32 %v489_v9, 0.0  ;;  %v721_v17 = vpack.c.bf16 %v671_v10, %v670_v14  ;;  %v510_v21 = vadd.f32 %v2705_v11, %v3109_v46 }
 0x11c   :  { %v501_v15 = vpop.f32.mrf.mxu0 }
 0x11d   :  { %v720_v16 = vpack.c.bf16 %v669_v13, %v668_v12  ;;  %v502_v19 = vadd.f32 %v3109_v46, %v501_v15  ;;  %v674_v28 = vmax.f32 %v510_v21, 0.0 }
 0x11e   :  { %v2706_v18 = vpop.f32.mrf.mxu0 }
 0x11f   :  { %v513_v20 = vadd.f32 %v2706_v18, %v3109_v46  ;;  %2771 = vmatprep.mubr.msk.bf16.mxu1 %vm779_vm0, %v720_v16  ;;  %v672_v26 = vmax.f32 %v502_v19, 0.0 }
 0x120   :  { %v504_v22 = vpop.f32.mrf.mxu0  ;;  %2772 = vmatmul.mubr.msk.bf16.gmra.mxu1 %vm779_vm0, %v721_v17 }
 0x121   :  { %v505_v23 = vadd.f32 %v3109_v46, %v504_v22  ;;  %v675_v24 = vmax.f32 %v513_v20, 0.0 }
 0x122   :  { %v2709_v25 = vpop.f32.mrf.mxu0 }
 0x123   :  { %v673_v27 = vmax.f32 %v505_v23, 0.0  ;;  %v723_v31 = vpack.c.bf16 %v675_v24, %v674_v28  ;;  %v526_v35 = vadd.f32 %v2709_v25, %v3109_v46 }
 0x124   :  { %v517_v29 = vpop.f32.mrf.mxu0 }
 0x125   :  { %v722_v30 = vpack.c.bf16 %v673_v27, %v672_v26  ;;  %v518_v33 = vadd.f32 %v3109_v46, %v517_v29  ;;  %v678_v42 = vmax.f32 %v526_v35, 0.0 }
 0x126   :  { %v2710_v32 = vpop.f32.mrf.mxu0 }
 0x127   :  { %v529_v34 = vadd.f32 %v2710_v32, %v3109_v46  ;;  %2775 = vmatprep.mubr.msk.bf16.mxu1 %vm779_vm0, %v722_v30  ;;  %v676_v40 = vmax.f32 %v518_v33, 0.0 }
 0x128   :  { %v520_v36 = vpop.f32.mrf.mxu0  ;;  %2776 = vmatmul.mubr.msk.bf16.gmra.mxu1 %vm779_vm0, %v723_v31 }
 0x129   :  { %v521_v37 = vadd.f32 %v3109_v46, %v520_v36  ;;  %v679_v38 = vmax.f32 %v529_v34, 0.0 }
 0x12a   :  { %v2713_v39 = vpop.f32.mrf.mxu0 }
 0x12b   :  { %v677_v41 = vmax.f32 %v521_v37, 0.0  ;;  %v725_v45 = vpack.c.bf16 %v679_v38, %v678_v42  ;;  %v542_v50 = vadd.f32 %v2713_v39, %v3109_v46 }
 0x12c   :  { %v533_v43 = vpop.f32.mrf.mxu0 }
 0x12d   :  { %v724_v44 = vpack.c.bf16 %v677_v41, %v676_v40  ;;  %v534_v48 = vadd.f32 %v3109_v46, %v533_v43  ;;  %v682_v57 = vmax.f32 %v542_v50, 0.0 }
 0x12e   :  { %v2714_v47 = vpop.f32.mrf.mxu0 }
 0x12f   :  { %v545_v49 = vadd.f32 %v2714_v47, %v3109_v46  ;;  %2779 = vmatprep.mubr.msk.bf16.mxu1 %vm779_vm0, %v724_v44  ;;  %v680_v55 = vmax.f32 %v534_v48, 0.0 }
 0x130   :  { %v536_v51 = vpop.f32.mrf.mxu0  ;;  %2780 = vmatmul.mubr.msk.bf16.gmra.mxu1 %vm779_vm0, %v725_v45 }
 0x131   :  { %v537_v52 = vadd.f32 %v3109_v46, %v536_v51  ;;  %v683_v53 = vmax.f32 %v545_v49, 0.0 }
 0x132   :  { %v2717_v54 = vpop.f32.mrf.mxu0 }
 0x133   :  { %v681_v56 = vmax.f32 %v537_v52, 0.0  ;;  %v727_v60 = vpack.c.bf16 %v683_v53, %v682_v57  ;;  %v558_v0 = vadd.f32 %v2717_v54, %v3109_v46 }
 0x134   :  { %v549_v58 = vpop.f32.mrf.mxu0 }
 0x135   :  { %v726_v59 = vpack.c.bf16 %v681_v56, %v680_v55  ;;  %v550_v62 = vadd.f32 %v3109_v46, %v549_v58  ;;  %v686_v7 = vmax.f32 %v558_v0, 0.0 }
 0x136   :  { %v2718_v61 = vpop.f32.mrf.mxu0 }
 0x137   :  { %v561_v63 = vadd.f32 %v2718_v61, %v3109_v46  ;;  %2783 = vmatprep.mubr.msk.bf16.mxu1 %vm779_vm0, %v726_v59  ;;  %v684_v5 = vmax.f32 %v550_v62, 0.0 }
 0x138   :  { %v552_v1 = vpop.f32.mrf.mxu0  ;;  %2784 = vmatmul.mubr.msk.bf16.gmra.mxu1 %vm779_vm0, %v727_v60 }
 0x139   :  { %v553_v2 = vadd.f32 %v3109_v46, %v552_v1  ;;  %v687_v3 = vmax.f32 %v561_v63, 0.0 }
 0x13a   :  { %v2721_v4 = vpop.f32.mrf.mxu0 }
 0x13b   :  { %v685_v6 = vmax.f32 %v553_v2, 0.0  ;;  %v729_v10 = vpack.c.bf16 %v687_v3, %v686_v7  ;;  %v574_v14 = vadd.f32 %v2721_v4, %v3109_v46 }
 0x13c   :  { %v565_v8 = vpop.f32.mrf.mxu0 }
 0x13d   :  { %v728_v9 = vpack.c.bf16 %v685_v6, %v684_v5  ;;  %v566_v12 = vadd.f32 %v3109_v46, %v565_v8  ;;  %v690_v21 = vmax.f32 %v574_v14, 0.0 }
 0x13e   :  { %v2722_v11 = vpop.f32.mrf.mxu0 }
 0x13f   :  { %v577_v13 = vadd.f32 %v2722_v11, %v3109_v46  ;;  %2787 = vmatprep.mubr.msk.bf16.mxu1 %vm779_vm0, %v728_v9  ;;  %v688_v19 = vmax.f32 %v566_v12, 0.0 }
 0x140   :  { %v568_v15 = vpop.f32.mrf.mxu0  ;;  %2788 = vmatmul.mubr.msk.bf16.gmra.mxu1 %vm779_vm0, %v729_v10 }
 0x141   :  { %v569_v16 = vadd.f32 %v3109_v46, %v568_v15  ;;  %v691_v17 = vmax.f32 %v577_v13, 0.0 }
 0x142   :  { %v2725_v18 = vpop.f32.mrf.mxu0 }
 0x143   :  { %v689_v20 = vmax.f32 %v569_v16, 0.0  ;;  %v731_v24 = vpack.c.bf16 %v691_v17, %v690_v21  ;;  %v590_v28 = vadd.f32 %v2725_v18, %v3109_v46  ;;  %v1381_v16 = vld [vmem:[%s3878_s5 + $0x1c0] sm:$0xff]  ;;  %v1382_v18 = vld [vmem:[%s3878_s5 + $0x1c8] sm:$0xff] }
 0x144   :  { %v581_v22 = vpop.f32.mrf.mxu0  ;;  %v1385_v17 = vld [vmem:[%s3878_s5 + $0x1e0] sm:$0xff] }
 0x145   :  { %v730_v23 = vpack.c.bf16 %v689_v20, %v688_v19  ;;  %v582_v26 = vadd.f32 %v3109_v46, %v581_v22  ;;  %v694_v35 = vmax.f32 %v590_v28, 0.0  ;;  %v2503_v19 = vcombine.low %v1381_v16, %v1385_v17  ;;  %v1378_v28 = vld [vmem:[%s3878_s5 + $0x1a8] sm:$0xff] }
 0x146   :  { %v2726_v25 = vpop.f32.mrf.mxu0  ;;  %v2504_v20 = vcombine.high %v1381_v16, %v1385_v17  ;;  %v1445_v16 = vld [vmem:[%s3878_s5 + $0x3c0] sm:$0xff] }
 0x147   :  { %v593_v27 = vadd.f32 %v2726_v25, %v3109_v46  ;;  %2791 = vmatprep.mubr.msk.bf16.mxu1 %vm779_vm0, %v730_v23  ;;  %v692_v33 = vmax.f32 %v582_v26, 0.0  ;;  %v1373_v23 = vld [vmem:[%s3878_s5 + $0x180] sm:$0xff]  ;;  %v1374_v25 = vld [vmem:[%s3878_s5 + $0x188] sm:$0xff] }
 0x148   :  { %v584_v29 = vpop.f32.mrf.mxu0  ;;  %2792 = vmatmul.mubr.msk.bf16.gmra.mxu1 %vm779_vm0, %v731_v24  ;;  %2113 = vmatprep.subr.bf16.mxu1 %v2504_v20  ;;  %v1377_v24 = vld [vmem:[%s3878_s5 + $0x1a0] sm:$0xff] }
 0x149   :  { %v585_v30 = vadd.f32 %v3109_v46, %v584_v29  ;;  %v695_v31 = vmax.f32 %v593_v27, 0.0  ;;  %2114 = vmatpush1.bf16.msra.mxu1 %v2503_v19  ;;  %v2495_v26 = vcombine.low %v1373_v23, %v1377_v24  ;;  %v2496_v27 = vcombine.high %v1373_v23, %v1377_v24  ;;  %v1449_v17 = vld [vmem:[%s3878_s5 + $0x3e0] sm:$0xff] }
 0x14a   :  { %v2729_v32 = vpop.f32.mrf.mxu0  ;;  %v2497_v29 = vcombine.low %v1374_v25, %v1378_v28  ;;  %v2567_v19 = vcombine.low %v1445_v16, %v1449_v17  ;;  %v2568_v20 = vcombine.high %v1445_v16, %v1449_v17  ;;  %v1437_v23 = vld [vmem:[%s3878_s5 + $0x380] sm:$0xff] }
 0x14b   :  { %v693_v34 = vmax.f32 %v585_v30, 0.0  ;;  %v606_v36 = vadd.f32 %v2729_v32, %v3109_v46  ;;  %v733_v40 = vpack.c.bf16 %v695_v31, %v694_v35  ;;  %v2498_v30 = vcombine.high %v1374_v25, %v1378_v28  ;;  %2115 = vmatprep.subr.bf16.mxu1 %v2496_v27  ;;  %v1365_v31 = vld [vmem:[%s3878_s5 + $0x140] sm:$0xff]  ;;  %v1438_v25 = vld [vmem:[%s3878_s5 + $0x388] sm:$0xff] }
 0x14c   :  { %v597_v37 = vpop.f32.mrf.mxu0  ;;  %v1369_v32 = vld [vmem:[%s3878_s5 + $0x160] sm:$0xff]  ;;  %v1442_v28 = vld [vmem:[%s3878_s5 + $0x3a8] sm:$0xff] }
 0x14d   :  { %v732_v38 = vpack.c.bf16 %v693_v34, %v692_v33  ;;  %v598_v39 = vadd.f32 %v3109_v46, %v597_v37  ;;  %v698_v43 = vmax.f32 %v606_v36, 0.0  ;;  %2116 = vmatpush1.bf16.msra.mxu1 %v2495_v26  ;;  %v1366_v33 = vld [vmem:[%s3878_s5 + $0x148] sm:$0xff]  ;;  %v2487_v34 = vcombine.low %v1365_v31, %v1369_v32  ;;  %v1441_v24 = vld [vmem:[%s3878_s5 + $0x3a0] sm:$0xff] }
 0x14e   :  { %v2730_v41 = vpop.f32.mrf.mxu0  ;;  %v2488_v35 = vcombine.high %v1365_v31, %v1369_v32  ;;  %v1370_v36 = vld [vmem:[%s3878_s5 + $0x168] sm:$0xff]  ;;  %v2559_v26 = vcombine.low %v1437_v23, %v1441_v24  ;;  %v2560_v27 = vcombine.high %v1437_v23, %v1441_v24  ;;  %v3410_v17 = vld [vmem:[%s3879_s4] ss:$0 sm:$0xff] }
 0x14f   :  { %v609_v42 = vadd.f32 %v2730_v41, %v3109_v46  ;;  %2795 = vmatprep.mubr.msk.bf16.mxu1 %vm779_vm0, %v732_v38  ;;  %v696_v45 = vmax.f32 %v598_v39, 0.0  ;;  %v2489_v37 = vcombine.low %v1366_v33, %v1370_v36  ;;  %v2490_v38 = vcombine.high %v1366_v33, %v1370_v36  ;;  %v1357_v39 = vld [vmem:[%s3878_s5 + $0x100] sm:$0xff]  ;;  %v1358_v41 = vld [vmem:[%s3878_s5 + $0x108] sm:$0xff] }
 0x150   :  { %v600_v44 = vpop.f32.mrf.mxu0  ;;  %2796 = vmatmul.mubr.msk.bf16.gmra.mxu1 %vm779_vm0, %v733_v40  ;;  %2117 = vmatprep.subr.bf16.mxu1 %v2488_v35  ;;  %v1361_v40 = vld [vmem:[%s3878_s5 + $0x120] sm:$0xff]  ;;  %v1430_v35 = vld [vmem:[%s3878_s5 + $0x348] sm:$0xff] }
 0x151   :  { %v699_v47 = vmax.f32 %v609_v42, 0.0  ;;  %v601_v48 = vadd.f32 %v3109_v46, %v600_v44  ;;  %2118 = vmatpush1.bf16.msra.mxu1 %v2487_v34  ;;  %v2479_v42 = vcombine.low %v1357_v39, %v1361_v40  ;;  %v1362_v44 = vld [vmem:[%s3878_s5 + $0x128] sm:$0xff]  ;;  %v1429_v33 = vld [vmem:[%s3878_s5 + $0x340] sm:$0xff] }
 0x152   :  { %v2733_v49 = vpop.f32.mrf.mxu0  ;;  %v1433_v34 = vld [vmem:[%s3878_s5 + $0x360] sm:$0xff]  ;;  %v1402_v24 = vld [vmem:[%s3878_s5 + $0x268] sm:$0xff] }
 0x153   :  { %v697_v50 = vmax.f32 %v601_v48, 0.0  ;;  %v735_v51 = vpack.c.bf16 %v699_v47, %v698_v43  ;;  %v622_v52 = vadd.f32 %v2733_v49, %v3109_v46  ;;  %v2480_v43 = vcombine.high %v1357_v39, %v1361_v40  ;;  %v1349_v48 = vld [vmem:[%s3878_s5 + $0xc0] sm:$0xff]  ;;  %v1434_v39 = vld [vmem:[%s3878_s5 + $0x368] sm:$0xff] }
 0x154   :  { %v613_v53 = vpop.f32.mrf.mxu0  ;;  %v2482_v47 = vcombine.high %v1358_v41, %v1362_v44  ;;  %v1353_v49 = vld [vmem:[%s3878_s5 + $0xe0] sm:$0xff]  ;;  %v2553_v40 = vcombine.low %v1430_v35, %v1434_v39 }
 0x155   :  { %v734_v54 = vpack.c.bf16 %v697_v50, %v696_v45  ;;  %v614_v55 = vadd.f32 %v3109_v46, %v613_v53  ;;  %v702_v58 = vmax.f32 %v622_v52, 0.0  ;;  %v2481_v45 = vcombine.low %v1358_v41, %v1362_v44  ;;  %2119 = vmatprep.subr.bf16.mxu1 %v2480_v43  ;;  %v1350_v50 = vld [vmem:[%s3878_s5 + $0xc8] sm:$0xff] }
 0x156   :  { %v2734_v56 = vpop.f32.mrf.mxu0  ;;  %2120 = vmatpush1.bf16.msra.mxu1 %v2479_v42  ;;  %v2472_v52 = vcombine.high %v1349_v48, %v1353_v49  ;;  %v1354_v53 = vld [vmem:[%s3878_s5 + $0xe8] sm:$0xff]  ;;  %v2554_v41 = vcombine.high %v1430_v35, %v1434_v39 }
 0x157   :  { %v625_v57 = vadd.f32 %v2734_v56, %v3109_v46  ;;  %2799 = vmatprep.mubr.msk.bf16.mxu1 %vm779_vm0, %v734_v54  ;;  %v700_v60 = vmax.f32 %v614_v55, 0.0  ;;  %v2473_v54 = vcombine.low %v1350_v50, %v1354_v53  ;;  %v2474_v55 = vcombine.high %v1350_v50, %v1354_v53  ;;  %v1341_v56 = vld [vmem:[%s3878_s5 + $0x80] sm:$0xff]  ;;  %v1394_v39 = vld [vmem:[%s3878_s5 + $0x228] sm:$0xff] }
 0x158   :  { %v616_v59 = vpop.f32.mrf.mxu0  ;;  %2800 = vmatmul.mubr.msk.bf16.gmra.mxu1 %vm779_vm0, %v735_v51  ;;  %v2471_v51 = vcombine.low %v1349_v48, %v1353_v49  ;;  %2121 = vmatprep.subr.bf16.mxu1 %v2472_v52  ;;  %v1422_v48 = vld [vmem:[%s3878_s5 + $0x308] sm:$0xff] }
 0x159   :  { %v703_v61 = vmax.f32 %v625_v57, 0.0  ;;  %v617_v62 = vadd.f32 %v3109_v46, %v616_v59  ;;  %v1345_v57 = vld [vmem:[%s3878_s5 + $0xa0] sm:$0xff]  ;;  %v1426_v52 = vld [vmem:[%s3878_s5 + $0x328] sm:$0xff] }
 0x15a   :  { %v2737_v63 = vpop.f32.mrf.mxu0  ;;  %2122 = vmatpush1.bf16.msra.mxu1 %v2471_v51  ;;  %v2463_v59 = vcombine.low %v1341_v56, %v1345_v57  ;;  %v2545_v53 = vcombine.low %v1422_v48, %v1426_v52 }
 0x15b   :  { %v701_v0 = vmax.f32 %v617_v62, 0.0  ;;  %v737_v1 = vpack.c.bf16 %v703_v61, %v702_v58  ;;  %v638_v2 = vadd.f32 %v2737_v63, %v3109_v46  ;;  %v1342_v58 = vld [vmem:[%s3878_s5 + $0x88] sm:$0xff] }
 0x15c   :  { %v629_v3 = vpop.f32.mrf.mxu0  ;;  %v1346_v61 = vld [vmem:[%s3878_s5 + $0xa8] sm:$0xff] }
 0x15d   :  { %v736_v4 = vpack.c.bf16 %v701_v0, %v700_v60  ;;  %v630_v5 = vadd.f32 %v3109_v46, %v629_v3  ;;  %v706_v8 = vmax.f32 %v638_v2, 0.0  ;;  %v2464_v60 = vcombine.high %v1341_v56, %v1345_v57  ;;  %v1333_v0 = vld [vmem:[%s3878_s5 + $0x40] sm:$0xff]  ;;  %v1334_v2 = vld [vmem:[%s3878_s5 + $0x48] sm:$0xff] }
 0x15e   :  { %v2738_v6 = vpop.f32.mrf.mxu0  ;;  %v2465_v62 = vcombine.low %v1342_v58, %v1346_v61  ;;  %v2466_v63 = vcombine.high %v1342_v58, %v1346_v61  ;;  %v1413_v58 = vld [vmem:[%s3878_s5 + $0x2c0] sm:$0xff] }
 0x15f   :  { %v641_v7 = vadd.f32 %v2738_v6, %v3109_v46  ;;  %2803 = vmatprep.mubr.msk.bf16.mxu1 %vm779_vm0, %v736_v4  ;;  %v704_v10 = vmax.f32 %v630_v5, 0.0  ;;  %2123 = vmatprep.subr.bf16.mxu1 %v2464_v60  ;;  %v1338_v5 = vld [vmem:[%s3878_s5 + $0x68] sm:$0xff] }
 0x160   :  { %v632_v9 = vpop.f32.mrf.mxu0  ;;  %2804 = vmatmul.mubr.msk.bf16.gmra.mxu1 %vm779_vm0, %v737_v1  ;;  %v1337_v1 = vld [vmem:[%s3878_s5 + $0x60] sm:$0xff]  ;;  %v2457_v6 = vcombine.low %v1334_v2, %v1338_v5  ;;  %v1414_v60 = vld [vmem:[%s3878_s5 + $0x2c8] sm:$0xff] }
 0x161   :  { %v707_v11 = vmax.f32 %v641_v7, 0.0  ;;  %v633_v12 = vadd.f32 %v3109_v46, %v632_v9  ;;  %v1386_v46 = vld [vmem:[%s3878_s5 + $0x1e8] sm:$0xff]  ;;  %2124 = vmatpush1.bf16.msra.mxu1 %v2463_v59  ;;  %v2455_v3 = vcombine.low %v1333_v0, %v1337_v1  ;;  %v2456_v4 = vcombine.high %v1333_v0, %v1337_v1  ;;  %v1329_v9 = vld [vmem:[%s3878_s5 + $0x20] sm:$0xff] }
 0x162   :  { %v2505_v21 = vcombine.low %v1382_v18, %v1386_v46  ;;  %v2506_v22 = vcombine.high %v1382_v18, %v1386_v46  ;;  %v2458_v7 = vcombine.high %v1334_v2, %v1338_v5  ;;  %v1446_v18 = vld [vmem:[%s3878_s5 + $0x3c8] sm:$0xff]  ;;  %v1417_v59 = vld [vmem:[%s3878_s5 + $0x2e0] sm:$0xff] }
 0x163   :  { %v705_v13 = vmax.f32 %v633_v12, 0.0  ;;  %v739_v14 = vpack.c.bf16 %v707_v11, %v706_v8  ;;  %2125 = vmatprep.subr.bf16.mxu1 %v2456_v4  ;;  %v1325_v8 = vld [vmem:[%s3878_s5] sm:$0xff]  ;;  %v1450_v46 = vld [vmem:[%s3878_s5 + $0x3e8] sm:$0xff] }
 0x164   :  { %2166 = vmatprep.subr.bf16.mxu0 %v2506_v22  ;;  %v2447_v11 = vcombine.low %v1325_v8, %v1329_v9  ;;  %v2448_v12 = vcombine.high %v1325_v8, %v1329_v9  ;;  %v2570_v22 = vcombine.high %v1446_v18, %v1450_v46  ;;  %v1418_v0 = vld [vmem:[%s3878_s5 + $0x2e8] sm:$0xff] }
 0x165   :  { %v738_v15 = vpack.c.bf16 %v705_v13, %v704_v10  ;;  %2167 = vmatpush1.bf16.msra.mxu0 %v2505_v21  ;;  %2126 = vmatpush1.bf16.msra.mxu1 %v2455_v3  ;;  %v1326_v10 = vld [vmem:[%s3878_s5 + $0x8] sm:$0xff]  ;;  %v2569_v21 = vcombine.low %v1446_v18, %v1450_v46  ;;  %v2537_v1 = vcombine.low %v1414_v60, %v1418_v0 }
 0x166   :  { %2168 = vmatprep.subr.bf16.mxu0 %v2498_v30  ;;  %v1330_v13 = vld [vmem:[%s3878_s5 + $0x28] sm:$0xff]  ;;  %2127 = vmatprep.subr.bf16.mxu1 %v2448_v12  ;;  %v2562_v30 = vcombine.high %v1438_v25, %v1442_v28  ;;  %v2538_v2 = vcombine.high %v1414_v60, %v1418_v0  ;;  %v3468_v0 = vld [vmem:[%s3878_s5 + $0x1f8] sm:$0xff] }
 0x167   :  { %2807 = vmatprep.mubr.msk.bf16.mxu1 %vm779_vm0, %v738_v15  ;;  %v2450_v15 = vcombine.high %v1326_v10, %v1330_v13  ;;  %v1406_v8 = vld [vmem:[%s3878_s5 + $0x288] sm:$0xff] }
 0x168   :  { %2808 = vmatmul.mubr.msk.bf16.gmra.mxu1 %vm779_vm0, %v739_v14  ;;  %v2449_v14 = vcombine.low %v1326_v10, %v1330_v13  ;;  %v1410_v12 = vld [vmem:[%s3878_s5 + $0x2a8] sm:$0xff] }
 0x169   :  { %2169 = vmatpush1.bf16.msra.mxu0 %v2497_v29  ;;  %2128 = vmatpush1.bf16.msra.mxu1 %v2447_v11  ;;  %v2561_v29 = vcombine.low %v1438_v25, %v1442_v28  ;;  %v2529_v13 = vcombine.low %v1406_v8, %v1410_v12  ;;  %v1398_v46 = vld [vmem:[%s3878_s5 + $0x248] sm:$0xff] }
 0x16a   :  { %2170 = vmatprep.subr.bf16.mxu0 %v2490_v38  ;;  %2129 = vmatprep.subr.bf16.mxu1 %v2568_v20  ;;  %v2552_v38 = vcombine.high %v1429_v33, %v1433_v34  ;;  %v1401_v20 = vld [vmem:[%s3878_s5 + $0x260] sm:$0xff]  ;;  %v2522_v28 = vcombine.high %v1398_v46, %v1402_v24 }
 0x16d   :  { %2171 = vmatpush1.bf16.msra.mxu0 %v2489_v37  ;;  %2130 = vmatpush2.bf16.msra.mxu1 %v2567_v19  ;;  %v2551_v37 = vcombine.low %v1429_v33, %v1433_v34  ;;  %v1397_v19 = vld [vmem:[%s3878_s5 + $0x240] sm:$0xff]  ;;  %v1390_v34 = vld [vmem:[%s3878_s5 + $0x208] sm:$0xff] }
 0x16e   :  { %2172 = vmatprep.subr.bf16.mxu0 %v2482_v47  ;;  %2131 = vmatprep.subr.bf16.mxu1 %v2560_v27  ;;  %v1425_v47 = vld [vmem:[%s3878_s5 + $0x320] sm:$0xff]  ;;  %v2520_v23 = vcombine.high %v1397_v19, %v1401_v20  ;;  %v2521_v27 = vcombine.low %v1398_v46, %v1402_v24 }
 0x16f   :  { %v1393_v33 = vld [vmem:[%s3878_s5 + $0x220] sm:$0xff] }
 0x171   :  { %2173 = vmatpush1.bf16.msra.mxu0 %v2481_v45  ;;  %2132 = vmatpush2.bf16.msra.mxu1 %v2559_v26  ;;  %v1421_v45 = vld [vmem:[%s3878_s5 + $0x300] sm:$0xff]  ;;  %v2519_v26 = vcombine.low %v1397_v19, %v1401_v20 }
 0x172   :  { %2174 = vmatprep.subr.bf16.mxu0 %v2474_v55  ;;  %2133 = vmatprep.subr.bf16.mxu1 %v2552_v38  ;;  %v2543_v50 = vcombine.low %v1421_v45, %v1425_v47  ;;  %v2544_v51 = vcombine.high %v1421_v45, %v1425_v47  ;;  %v2513_v45 = vcombine.low %v1390_v34, %v1394_v39 }
 0x173   :  { %v2514_v47 = vcombine.high %v1390_v34, %v1394_v39 }
 0x175   :  { %2175 = vmatpush1.bf16.msra.mxu0 %v2473_v54  ;;  %2134 = vmatpush2.bf16.msra.mxu1 %v2551_v37  ;;  %v2546_v54 = vcombine.high %v1422_v48, %v1426_v52 }
 0x176   :  { %2176 = vmatprep.subr.bf16.mxu0 %v2466_v63  ;;  %2135 = vmatprep.subr.bf16.mxu1 %v2544_v51  ;;  %v2536_v63 = vcombine.high %v1413_v58, %v1417_v59 }
 0x179   :  { %2177 = vmatpush1.bf16.msra.mxu0 %v2465_v62  ;;  %2136 = vmatpush2.bf16.msra.mxu1 %v2543_v50  ;;  %v2535_v62 = vcombine.low %v1413_v58, %v1417_v59  ;;  %v3449_v58 = vld [vmem:[%s3878_s5 + $0x1d0] sm:$0xff] }
 0x17a   :  { %2178 = vmatprep.subr.bf16.mxu0 %v2458_v7  ;;  %2137 = vmatprep.subr.bf16.mxu1 %v2536_v63  ;;  %v1409_v7 = vld [vmem:[%s3878_s5 + $0x2a0] sm:$0xff]  ;;  %v3454_v59 = vld [vmem:[%s3878_s5 + $0x1f0] sm:$0xff] }
 0x17b   :  { %v2508_v63 = vcombine.high %v3449_v58, %v3454_v59 }
 0x17d   :  { %2179 = vmatpush1.bf16.msra.mxu0 %v2457_v6  ;;  %2138 = vmatpush2.bf16.msra.mxu1 %v2535_v62  ;;  %v1405_v6 = vld [vmem:[%s3878_s5 + $0x280] sm:$0xff]  ;;  %v2507_v62 = vcombine.low %v3449_v58, %v3454_v59  ;;  %v1360_v58 = vld [vmem:[%s3878_s5 + $0x118] sm:$0xff] }
 0x17e   :  { %2180 = vmatprep.subr.bf16.mxu0 %v2450_v15  ;;  %v2527_v10 = vcombine.low %v1405_v6, %v1409_v7  ;;  %v2528_v11 = vcombine.high %v1405_v6, %v1409_v7  ;;  %v1364_v59 = vld [vmem:[%s3878_s5 + $0x138] sm:$0xff] }
 0x180   :  { %2139 = vmatprep.subr.bf16.mxu1 %v2528_v11 }
 0x181   :  { %2181 = vmatpush1.bf16.msra.mxu0 %v2449_v14  ;;  %v2530_v14 = vcombine.high %v1406_v8, %v1410_v12  ;;  %2140 = vmatpush2.bf16.msra.mxu1 %v2527_v10 }
 0x182   :  { %2182 = vmatprep.subr.bf16.mxu0 %v2570_v22  ;;  %2141 = vmatprep.subr.bf16.mxu1 %v2520_v23 }
 0x185   :  { %2183 = vmatpush2.bf16.msra.mxu0 %v2569_v21  ;;  %2142 = vmatpush2.bf16.msra.mxu1 %v2519_v26 }
 0x186   :  { %2184 = vmatprep.subr.bf16.mxu0 %v2562_v30 }
 0x189   :  { %2185 = vmatpush2.bf16.msra.mxu0 %v2561_v29 }
 0x18a   :  { %2186 = vmatprep.subr.bf16.mxu0 %v2554_v41 }
 0x18d   :  { %2187 = vmatpush2.bf16.msra.mxu0 %v2553_v40 }
 0x18e   :  { %2188 = vmatprep.subr.bf16.mxu0 %v2546_v54 }
 0x191   :  { %2189 = vmatpush2.bf16.msra.mxu0 %v2545_v53 }
 0x192   :  { %2190 = vmatprep.subr.bf16.mxu0 %v2538_v2 }
 0x195   :  { %2191 = vmatpush2.bf16.msra.mxu0 %v2537_v1 }
 0x196   :  { %2192 = vmatprep.subr.bf16.mxu0 %v2530_v14 }
 0x199   :  { %2193 = vmatpush2.bf16.msra.mxu0 %v2529_v13 }
 0x19a   :  { %2194 = vmatprep.subr.bf16.mxu0 %v2522_v28 }
 0x19d   :  { %2195 = vmatpush2.bf16.msra.mxu0 %v2521_v27 }
 0x19e   :  { %2196 = vmatprep.subr.bf16.mxu0 %v2514_v47 }
 0x1a1   :  { %2197 = vmatpush2.bf16.msra.mxu0 %v2513_v45 }
 0x1b0   :  { %v3327_v31 = vpop.f32.mrf.mxu1 }
 0x1b2   :  { %v3329_v32 = vpop.f32.mrf.mxu1 }
 0x1b3   :  { %v911_v21 = vadd.f32 %v3410_v17, %v3329_v32  ;;  %v1389_v32 = vld [vmem:[%s3878_s5 + $0x200] sm:$0xff] }
 0x1b4   :  { %v3340_v36 = vpop.f32.mrf.mxu1  ;;  %v2512_v38 = vcombine.high %v1389_v32, %v1393_v33  ;;  %v2511_v41 = vcombine.low %v1389_v32, %v1393_v33 }
 0x1b5   :  { %v922_v1 = vadd.f32 %v3340_v36, %v3410_v17 }
 0x1b6   :  { %v3345_v42 = vpop.f32.mrf.mxu1  ;;  %2143 = vmatprep.subr.bf16.mxu1 %v2512_v38 }
 0x1b7   :  { %v914_v35 = vadd.f32 %v3410_v17, %v3345_v42  ;;  %2144 = vmatpush2.bf16.msra.mxu1 %v2511_v41  ;;  %v919_v42 = vadd.f32 %v3327_v31, %v3410_v17  ;;  %v3459_v31 = vld [vmem:[%s3878_s5 + $0x1d8] sm:$0xff] }
 0x1b8   :  { %v3347_v43 = vpop.f32.mrf.mxu1  ;;  %v2509_v2 = vcombine.low %v3459_v31, %v3468_v0  ;;  %v2510_v6 = vcombine.high %v3459_v31, %v3468_v0  ;;  %2219 = vmatprep.subr.bf16.mxu1 %v2508_v63 }
 0x1ba   :  { %v3349_v44 = vpop.f32.mrf.mxu1  ;;  %2272 = vmatprep.subr.bf16.mxu0 %v2510_v6 }
 0x1bb   :  { %v927_v12 = vadd.f32 %v3410_v17, %v3349_v44 }
 0x1bc   :  { %v3360_v49 = vpop.f32.mrf.mxu1 }
 0x1bd   :  { %v938_v26 = vadd.f32 %v3360_v49, %v3410_v17 }
 0x1be   :  { %v3365_v55 = vpop.f32.mrf.mxu1 }
 0x1c0   :  { %v3367_v56 = vpop.f32.mrf.mxu1 }
 0x1c2   :  { %v3369_v57 = vpop.f32.mrf.mxu1 }
 0x1c4   :  { %v3380_v61 = vpop.f32.mrf.mxu1 }
 0x1c6   :  { %v3385_v3 = vpop.f32.mrf.mxu1 }
 0x1c7   :  { %v946_v49 = vadd.f32 %v3410_v17, %v3385_v3  ;;  %v954_v3 = vadd.f32 %v3380_v61, %v3410_v17 }
 0x1c8   :  { %v3387_v4 = vpop.f32.mrf.mxu1 }
 0x1ca   :  { %v3389_v5 = vpop.f32.mrf.mxu1 }
 0x1cc   :  { %v3400_v9 = vpop.f32.mrf.mxu1 }
 0x1ce   :  { %v3405_v15 = vpop.f32.mrf.mxu1 }
 0x1cf   :  { %v962_v61 = vadd.f32 %v3410_v17, %v3405_v15  ;;  %v970_v15 = vadd.f32 %v3400_v9, %v3410_v17 }
 0x1d0   :  { %v2765_v16 = vpop.f32.mrf.mxu1 }
 0x1d1   :  { %v983_v48 = vadd.f32 %v2765_v16, %v3410_v17 }
 0x1d2   :  { %v974_v18 = vpop.f32.mrf.mxu1 }
 0x1d3   :  { %v975_v22 = vadd.f32 %v3410_v17, %v974_v18  ;;  %v2815_v54 = vpack.i.bf16 %v919_v42, %v983_v48  ;;  %v930_v18 = vadd.f32 %v3410_v17, %v3365_v55 }
 0x1d4   :  { %v2766_v25 = vpop.f32.mrf.mxu1 }
 0x1d5   :  { %v2811_v29 = vpack.i.bf16 %v911_v21, %v975_v22  ;;  %v986_v53 = vadd.f32 %v2766_v25, %v3410_v17  ;;  %v935_v22 = vadd.f32 %v3347_v43, %v3410_v17 }
 0x1d6   :  { %v977_v30 = vpop.f32.mrf.mxu1 }
 0x1d7   :  { %v978_v37 = vadd.f32 %v3410_v17, %v977_v30  ;;  %2812 = vxpose.xlu0.b32.start [1/16] (narrow) %v2811_v29, 16  ;;  %v2817_v10 = vpack.i.bf16 %v922_v1, %v986_v53  ;;  %v943_v30 = vadd.f32 %v3410_v17, %v3369_v57  ;;  %v951_v57 = vadd.f32 %v3367_v56, %v3410_v17 }
 0x1d8   :  { %v2769_v40 = vpop.f32.mrf.mxu1  ;;  %v959_v56 = vadd.f32 %v3410_v17, %v3389_v5  ;;  %v967_v5 = vadd.f32 %v3387_v4, %v3410_v17 }
 0x1d9   :  { %v2813_v50 = vpack.i.bf16 %v914_v35, %v978_v37  ;;  %v999_v20 = vadd.f32 %v2769_v40, %v3410_v17 }
 0x1da   :  { %v990_v51 = vpop.f32.mrf.mxu1 }
 0x1db   :  { %2814 = vxpose.xlu0.b32.cont [2/16] (narrow) %v2813_v50, 16  ;;  %v991_v8 = vadd.f32 %v3410_v17, %v990_v51  ;;  %v2823_v24 = vpack.i.bf16 %v935_v22, %v999_v20 }
 0x1dc   :  { %v2770_v52 = vpop.f32.mrf.mxu1 }
 0x1dd   :  { %v2819_v14 = vpack.i.bf16 %v927_v12, %v991_v8  ;;  %v1002_v23 = vadd.f32 %v2770_v52, %v3410_v17 }
 0x1de   :  { %v993_v60 = vpop.f32.mrf.mxu1 }
 0x1df   :  { %2816 = vxpose.xlu0.b32.cont [3/16] (narrow) %v2815_v54, 16  ;;  %v994_v36 = vadd.f32 %v3410_v17, %v993_v60  ;;  %v2825_v28 = vpack.i.bf16 %v938_v26, %v1002_v23 }
 0x1e0   :  { %v2773_v7 = vpop.f32.mrf.mxu1 }
 0x1e1   :  { %v2821_v46 = vpack.i.bf16 %v930_v18, %v994_v36  ;;  %v1015_v37 = vadd.f32 %v2773_v7, %v3410_v17 }
 0x1e2   :  { %v1006_v11 = vpop.f32.mrf.mxu1 }
 0x1e3   :  { %2818 = vxpose.xlu0.b32.cont [4/16] (narrow) %v2817_v10, 16  ;;  %v1007_v27 = vadd.f32 %v3410_v17, %v1006_v11  ;;  %v2831_v45 = vpack.i.bf16 %v951_v57, %v1015_v37 }
 0x1e4   :  { %v2774_v13 = vpop.f32.mrf.mxu1 }
 0x1e5   :  { %v2827_v33 = vpack.i.bf16 %v943_v30, %v1007_v27  ;;  %v1018_v41 = vadd.f32 %v2774_v13, %v3410_v17 }
 0x1e6   :  { %v1009_v16 = vpop.f32.mrf.mxu1 }
 0x1e7   :  { %2820 = vxpose.xlu0.b32.cont [5/16] (narrow) %v2819_v14, 16  ;;  %v1010_v32 = vadd.f32 %v3410_v17, %v1009_v16  ;;  %v2833_v51 = vpack.i.bf16 %v954_v3, %v1018_v41 }
 0x1e8   :  { %v2777_v19 = vpop.f32.mrf.mxu1 }
 0x1e9   :  { %v2829_v38 = vpack.i.bf16 %v946_v49, %v1010_v32  ;;  %v1031_v1 = vadd.f32 %v2777_v19, %v3410_v17 }
 0x1ea   :  { %v1022_v21 = vpop.f32.mrf.mxu1 }
 0x1eb   :  { %2822 = vxpose.xlu0.b32.cont [6/16] (narrow) %v2821_v46, 16  ;;  %v1023_v50 = vadd.f32 %v3410_v17, %v1022_v21  ;;  %v2839_v11 = vpack.i.bf16 %v967_v5, %v1031_v1 }
 0x1ec   :  { %v2778_v44 = vpop.f32.mrf.mxu1 }
 0x1ed   :  { %v2835_v54 = vpack.i.bf16 %v959_v56, %v1023_v50  ;;  %v1034_v10 = vadd.f32 %v2778_v44, %v3410_v17 }
 0x1ee   :  { %v1025_v25 = vpop.f32.mrf.mxu1 }
 0x1ef   :  { %2824 = vxpose.xlu0.b32.cont [7/16] (narrow) %v2823_v24, 16  ;;  %v1026_v53 = vadd.f32 %v3410_v17, %v1025_v25  ;;  %v2841_v36 = vpack.i.bf16 %v970_v15, %v1034_v10 }
 0x1f0   :  { %v3488_v55 = vpop.f32.mrf.mxu1 }
 0x1f1   :  { %v2837_v6 = vpack.i.bf16 %v962_v61, %v1026_v53  ;;  %v1047_v24 = vadd.f32 %v3488_v55, %v3410_v17 }
 0x1f2   :  { %v1038_v29 = vpop.f32.mrf.mxu1 }
 0x1f3   :  { %2826 = vxpose.xlu0.b32.cont [8/16] (narrow) %v2825_v28, 16  ;;  %v1039_v16 = vadd.f32 %v3410_v17, %v1038_v29 }
 0x1f4   :  { %v3493_v43 = vpop.f32.mrf.mxu1 }
 0x1f5   :  { %v1050_v28 = vadd.f32 %v3493_v43, %v3410_v17 }
 0x1f6   :  { %v1041_v34 = vpop.f32.mrf.mxu1 }
 0x1f7   :  { %2828 = vxpose.xlu0.b32.cont [9/16] (narrow) %v2827_v33, 16  ;;  %v1042_v46 = vadd.f32 %v3410_v17, %v1041_v34 }
 0x1f8   :  { %v3498_v35 = vpop.f32.mrf.mxu1 }
 0x1f9   :  { %v1063_v43 = vadd.f32 %v3498_v35, %v3410_v17 }
 0x1fa   :  { %v1054_v39 = vpop.f32.mrf.mxu1 }
 0x1fb   :  { %2830 = vxpose.xlu0.b32.cont [10/16] (narrow) %v2829_v38, 16  ;;  %v1055_v33 = vadd.f32 %v3410_v17, %v1054_v39 }
 0x1fc   :  { %v3503_v40 = vpop.f32.mrf.mxu1 }
 0x1fd   :  { %v1066_v50 = vadd.f32 %v3503_v40, %v3410_v17 }
 0x1fe   :  { %v1057_v47 = vpop.f32.mrf.mxu1 }
 0x1ff   :  { %2832 = vxpose.xlu0.b32.cont [11/16] (narrow) %v2831_v45, 16  ;;  %v1058_v37 = vadd.f32 %v3410_v17, %v1057_v47 }
 0x200   :  { %v3508_v48 = vpop.f32.mrf.mxu1 }
 0x201   :  { %v1079_v10 = vadd.f32 %v3508_v48, %v3410_v17 }
 0x202   :  { %v3511_v42 = vpop.f32.mrf.mxu1 }
 0x203   :  { %2834 = vxpose.xlu0.b32.cont [12/16] (narrow) %v2833_v51, 16  ;;  %v1071_v53 = vadd.f32 %v3410_v17, %v3511_v42 }
 0x204   :  { %v3515_v52 = vpop.f32.mrf.mxu1 }
 0x206   :  { %v3518_v60 = vpop.f32.mrf.mxu1 }
 0x207   :  { %2836 = vxpose.xlu0.b32.cont [13/16] (narrow) %v2835_v54, 16  ;;  %v1074_v1 = vadd.f32 %v3410_v17, %v3518_v60 }
 0x208   :  { %v3522_v63 = vpop.f32.mrf.mxu1 }
 0x20a   :  { %v3525_v7 = vpop.f32.mrf.mxu1 }
 0x20b   :  { %2838 = vxpose.xlu0.b32.cont [14/16] (narrow) %v2837_v6, 16 }
 0x20c   :  { %v3529_v8 = vpop.f32.mrf.mxu1 }
 0x20e   :  { %v3532_v12 = vpop.f32.mrf.mxu1 }
 0x20f   :  { %2840 = vxpose.xlu0.b32.cont [15/16] (narrow) %v2839_v11, 16 }
 0x210   :  { %v2797_v13 = vpop.f32.mrf.mxu1 }
 0x211   :  { %v1111_v9 = vadd.f32 %v2797_v13, %v3410_v17  ;;  %v1082_v13 = vadd.f32 %v3515_v52, %v3410_v17  ;;  %v1095_v52 = vadd.f32 %v3522_v63, %v3410_v17 }
 0x212   :  { %v1102_v14 = vpop.f32.mrf.mxu1 }
 0x213   :  { %v1103_v18 = vadd.f32 %v3410_v17, %v1102_v14  ;;  %2842 = vxpose.xlu0.b32.end [16/16] (narrow) %v2841_v36, 16  ;;  %v2857_v26 = vpack.i.bf16 %v1047_v24, %v1111_v9  ;;  %v1375_v24 = vld [vmem:[%s3878_s5 + $0x190] sm:$0xff] }
 0x214   :  { %v2798_v4 = vpop.f32.mrf.mxu1 }
 0x215   :  { %v2853_v19 = vpack.i.bf16 %v1039_v16, %v1103_v18  ;;  %v1114_v25 = vadd.f32 %v2798_v4, %v3410_v17  ;;  %v1087_v16 = vadd.f32 %v3410_v17, %v3525_v7  ;;  %v1090_v4 = vadd.f32 %v3410_v17, %v3532_v12 }
 0x216   :  { %v1105_v20 = vpop.f32.mrf.mxu1  ;;  %v1098_v7 = vadd.f32 %v3529_v8, %v3410_v17  ;;  %v1380_v8 = vld [vmem:[%s3878_s5 + $0x1b8] sm:$0xff] }
 0x217   :  { %v1106_v21 = vadd.f32 %v3410_v17, %v1105_v20  ;;  %2854 = vxpose.xlu1.b32.start [1/16] (narrow) %v2853_v19, 16  ;;  %v2859_v30 = vpack.i.bf16 %v1050_v28, %v1114_v25 }
 0x218   :  { %v2801_v22 = vpop.f32.mrf.mxu1 }
 0x219   :  { %v2855_v44 = vpack.i.bf16 %v1042_v46, %v1106_v21  ;;  %v1127_v38 = vadd.f32 %v2801_v22, %v3410_v17 }
 0x21a   :  { %v1118_v23 = vpop.f32.mrf.mxu1 }
 0x21b   :  { %2856 = vxpose.xlu1.b32.cont [2/16] (narrow) %v2855_v44, 16  ;;  %v1119_v29 = vadd.f32 %v3410_v17, %v1118_v23  ;;  %v2865_v3 = vpack.i.bf16 %v1063_v43, %v1127_v38  ;;  %v1363_v43 = vld [vmem:[%s3878_s5 + $0x130] sm:$0xff] }
 0x21c   :  { %v2802_v27 = vpop.f32.mrf.mxu1 }
 0x21d   :  { %v2861_v49 = vpack.i.bf16 %v1055_v33, %v1119_v29  ;;  %v1130_v45 = vadd.f32 %v2802_v27, %v3410_v17  ;;  %v1371_v33 = vld [vmem:[%s3878_s5 + $0x170] sm:$0xff] }
 0x21e   :  { %v1121_v32 = vpop.f32.mrf.mxu1 }
 0x21f   :  { %2858 = vxpose.xlu1.b32.cont [3/16] (narrow) %v2857_v26, 16  ;;  %v1122_v34 = vadd.f32 %v3410_v17, %v1121_v32  ;;  %v2867_v47 = vpack.i.bf16 %v1066_v50, %v1130_v45  ;;  %v1379_v26 = vld [vmem:[%s3878_s5 + $0x1b0] sm:$0xff]  ;;  %v1356_v50 = vld [vmem:[%s3878_s5 + $0xf8] sm:$0xff] }
 0x220   :  { %v2805_v55 = vpop.f32.mrf.mxu1  ;;  %v2500_v29 = vcombine.high %v1375_v24, %v1379_v26  ;;  %v1367_v32 = vld [vmem:[%s3878_s5 + $0x150] sm:$0xff] }
 0x221   :  { %v2863_v57 = vpack.i.bf16 %v1058_v37, %v1122_v34  ;;  %v1143_v6 = vadd.f32 %v2805_v55, %v3410_v17  ;;  %v1368_v34 = vld [vmem:[%s3878_s5 + $0x158] sm:$0xff]  ;;  %v2499_v55 = vcombine.low %v1375_v24, %v1379_v26  ;;  %v2492_v38 = vcombine.high %v1367_v32, %v1371_v33  ;;  %v1351_v45 = vld [vmem:[%s3878_s5 + $0xd0] sm:$0xff] }
 0x222   :  { %v1134_v41 = vpop.f32.mrf.mxu1  ;;  %v2491_v31 = vcombine.low %v1367_v32, %v1371_v33  ;;  %v1443_v26 = vld [vmem:[%s3878_s5 + $0x3b0] sm:$0xff] }
 0x223   :  { %2860 = vxpose.xlu1.b32.cont [4/16] (narrow) %v2859_v30, 16  ;;  %v1135_v51 = vadd.f32 %v3410_v17, %v1134_v41  ;;  %v2873_v42 = vpack.i.bf16 %v1079_v10, %v1143_v6  ;;  %v1359_v41 = vld [vmem:[%s3878_s5 + $0x110] sm:$0xff] }
 0x224   :  { %v2806_v39 = vpop.f32.mrf.mxu1  ;;  %v2484_v0 = vcombine.high %v1359_v41, %v1363_v43 }
 0x225   :  { %v2869_v35 = vpack.i.bf16 %v1071_v53, %v1135_v51  ;;  %v1146_v11 = vadd.f32 %v2806_v39, %v3410_v17  ;;  %v1352_v39 = vld [vmem:[%s3878_s5 + $0xd8] sm:$0xff]  ;;  %v2483_v51 = vcombine.low %v1359_v41, %v1363_v43 }
 0x226   :  { %v1137_v56 = vpop.f32.mrf.mxu1  ;;  %v2478_v53 = vcombine.high %v1352_v39, %v1356_v50 }
 0x227   :  { %2862 = vxpose.xlu1.b32.cont [5/16] (narrow) %v2861_v49, 16  ;;  %v1138_v54 = vadd.f32 %v3410_v17, %v1137_v56  ;;  %v2875_v60 = vpack.i.bf16 %v1082_v13, %v1146_v11  ;;  %v1372_v49 = vld [vmem:[%s3878_s5 + $0x178] sm:$0xff]  ;;  %v1335_v11 = vld [vmem:[%s3878_s5 + $0x50] sm:$0xff] }
 0x228   :  { %v2809_v61 = vpop.f32.mrf.mxu1  ;;  %v1340_v13 = vld [vmem:[%s3878_s5 + $0x78] sm:$0xff] }
 0x229   :  { %v2871_v40 = vpack.i.bf16 %v1074_v1, %v1138_v54  ;;  %v1159_v19 = vadd.f32 %v2809_v61, %v3410_v17  ;;  %v1343_v54 = vld [vmem:[%s3878_s5 + $0x90] sm:$0xff]  ;;  %v1344_v61 = vld [vmem:[%s3878_s5 + $0x98] sm:$0xff] }
 0x22a   :  { %v1150_v5 = vpop.f32.mrf.mxu1  ;;  %v1348_v1 = vld [vmem:[%s3878_s5 + $0xb8] sm:$0xff] }
 0x22b   :  { %2864 = vxpose.xlu1.b32.cont [6/16] (narrow) %v2863_v57, 16  ;;  %v1151_v36 = vadd.f32 %v3410_v17, %v1150_v5  ;;  %v2881_v21 = vpack.i.bf16 %v1095_v52, %v1159_v19  ;;  %v2494_v57 = vcombine.high %v1368_v34, %v1372_v49  ;;  %v2470_v10 = vcombine.high %v1344_v61, %v1348_v1  ;;  %v1332_v19 = vld [vmem:[%s3878_s5 + $0x38] sm:$0xff] }
 0x22c   :  { %v2810_v15 = vpop.f32.mrf.mxu1 }
 0x22d   :  { %v2877_v48 = vpack.i.bf16 %v1087_v16, %v1151_v36  ;;  %v1162_v46 = vadd.f32 %v2810_v15, %v3410_v17  ;;  %v1336_v15 = vld [vmem:[%s3878_s5 + $0x58] sm:$0xff] }
 0x22e   :  { %v1153_v14 = vpop.f32.mrf.mxu1  ;;  %v2462_v16 = vcombine.high %v1336_v15, %v1340_v13  ;;  %v2461_v52 = vcombine.low %v1336_v15, %v1340_v13  ;;  %v1399_v15 = vld [vmem:[%s3878_s5 + $0x250] sm:$0xff] }
 0x22f   :  { %2866 = vxpose.xlu1.b32.cont [7/16] (narrow) %v2865_v3, 16  ;;  %v1154_v18 = vadd.f32 %v3410_v17, %v1153_v14  ;;  %v2883_v22 = vpack.i.bf16 %v1098_v7, %v1162_v46  ;;  %v1376_v17 = vld [vmem:[%s3878_s5 + $0x198] sm:$0xff]  ;;  %v1355_v3 = vld [vmem:[%s3878_s5 + $0xf0] sm:$0xff] }
 0x230   :  { %v2502_v30 = vcombine.high %v1376_v17, %v1380_v8  ;;  %v2501_v37 = vcombine.low %v1376_v17, %v1380_v8  ;;  %v2476_v56 = vcombine.high %v1351_v45, %v1355_v3  ;;  %v2475_v6 = vcombine.low %v1351_v45, %v1355_v3  ;;  %v1447_v7 = vld [vmem:[%s3878_s5 + $0x3d0] sm:$0xff]  ;;  %v1440_v17 = vld [vmem:[%s3878_s5 + $0x398] sm:$0xff] }
 0x231   :  { %v2879_v20 = vpack.i.bf16 %v1090_v4, %v1154_v18  ;;  %v1327_v18 = vld [vmem:[%s3878_s5 + $0x10] sm:$0xff]  ;;  %v1328_v4 = vld [vmem:[%s3878_s5 + $0x18] sm:$0xff] }
 0x232   :  { %v1444_v8 = vld [vmem:[%s3878_s5 + $0x3b8] sm:$0xff]  ;;  %v1403_v13 = vld [vmem:[%s3878_s5 + $0x270] sm:$0xff] }
 0x233   :  { %2868 = vxpose.xlu1.b32.cont [8/16] (narrow) %v2867_v47, 16  ;;  %v2485_v47 = vcombine.low %v1360_v58, %v1364_v59  ;;  %v2566_v33 = vcombine.high %v1440_v17, %v1444_v8 }
 0x237   :  { %2870 = vxpose.xlu1.b32.cont [9/16] (narrow) %v2869_v35, 16  ;;  %v1347_v35 = vld [vmem:[%s3878_s5 + $0xb0] sm:$0xff] }
 0x238   :  { %v2468_v5 = vcombine.high %v1343_v54, %v1347_v35  ;;  %v2467_v36 = vcombine.low %v1343_v54, %v1347_v35 }
 0x23b   :  { %2872 = vxpose.xlu1.b32.cont [10/16] (narrow) %v2871_v40, 16  ;;  %v2477_v40 = vcombine.low %v1352_v39, %v1356_v50  ;;  %v1415_v39 = vld [vmem:[%s3878_s5 + $0x2d0] sm:$0xff] }
 0x23c   :  { %v1419_v50 = vld [vmem:[%s3878_s5 + $0x2f0] sm:$0xff] }
 0x23d   :  { %v2540_v54 = vcombine.high %v1415_v39, %v1419_v50 }
 0x23f   :  { %2874 = vxpose.xlu1.b32.cont [11/16] (narrow) %v2873_v42, 16  ;;  %v1339_v42 = vld [vmem:[%s3878_s5 + $0x70] sm:$0xff] }
 0x240   :  { %v2460_v14 = vcombine.high %v1335_v11, %v1339_v42 }
 0x243   :  { %2876 = vxpose.xlu1.b32.cont [12/16] (narrow) %v2875_v60, 16  ;;  %v2469_v60 = vcombine.low %v1344_v61, %v1348_v1  ;;  %v1407_v61 = vld [vmem:[%s3878_s5 + $0x290] sm:$0xff] }
 0x244   :  { %v1411_v1 = vld [vmem:[%s3878_s5 + $0x2b0] sm:$0xff] }
 0x247   :  { %2878 = vxpose.xlu1.b32.cont [13/16] (narrow) %v2877_v48, 16  ;;  %v1331_v48 = vld [vmem:[%s3878_s5 + $0x30] sm:$0xff] }
 0x248   :  { %v2452_v46 = vcombine.high %v1327_v18, %v1331_v48 }
 0x24b   :  { %2880 = vxpose.xlu1.b32.cont [14/16] (narrow) %v2879_v20, 16  ;;  %v2459_v20 = vcombine.low %v1335_v11, %v1339_v42  ;;  %v2532_v11 = vcombine.high %v1407_v61, %v1411_v1 }
 0x24f   :  { %2882 = vxpose.xlu1.b32.cont [15/16] (narrow) %v2881_v21, 16  ;;  %v2454_v21 = vcombine.high %v1328_v4, %v1332_v19 }
 0x253   :  { %2884 = vxpose.xlu1.b32.end [16/16] (narrow) %v2883_v22, 16  ;;  %v2843_v9 = vpop.trf.xlu0  ;;  %v1451_v22 = vld [vmem:[%s3878_s5 + $0x3f0] sm:$0xff] }
 0x254   :  { %v2847_v44 = vunpack.i.h.bf16 %v2843_v9  ;;  %v2844_v12 = vunpack.i.l.bf16 %v2843_v9  ;;  %v1448_v9 = vld [vmem:[%s3878_s5 + $0x3d8] sm:$0xff]  ;;  %v2572_v24 = vcombine.high %v1447_v7, %v1451_v22 }
 0x257   :  { %v2848_v23 = vpop.trf.xlu0 }
 0x258   :  { %v2852_v25 = vunpack.i.h.bf16 %v2848_v23  ;;  %v2849_v63 = vunpack.i.l.bf16 %v2848_v23  ;;  %v2453_v23 = vcombine.low %v1328_v4, %v1332_v19  ;;  %v1391_v4 = vld [vmem:[%s3878_s5 + $0x210] sm:$0xff] }
 0x259   :  { %v1395_v19 = vld [vmem:[%s3878_s5 + $0x230] sm:$0xff] }
 0x25a   :  { %v3592_v27 = vpack.c.bf16 %v2852_v25, %v2847_v44  ;;  %v3594_v28 = vpack.c.bf16 %v2849_v63, %v2844_v12  ;;  %v1452_v44 = vld [vmem:[%s3878_s5 + $0x3f8] sm:$0xff]  ;;  %v2451_v12 = vcombine.low %v1327_v18, %v1331_v48  ;;  %v1439_v63 = vld [vmem:[%s3878_s5 + $0x390] sm:$0xff]  ;;  %v2524_v18 = vcombine.high %v1399_v15, %v1403_v13 }
 0x25b   :  { %v2574_v25 = vcombine.high %v1448_v9, %v1452_v44  ;;  %v2564_v32 = vcombine.high %v1439_v63, %v1443_v26 }
 0x25c   :  { %2145 = vmatprep.mubr.bf16.mxu1 %v3594_v28  ;;  %2198 = vmatprep.mubr.bf16.mxu0 %v3594_v28 }
 0x25d   :  { %2146 = vmatmul.mubr.bf16.vlgmr.msra.gmra.mxu1 %v3592_v27  ;;  %2199 = vmatmul.mubr.bf16.vlgmr.msra.gmra.mxu0 %v3592_v27 }
 0x25e   :  { %2220 = vmatpush1.bf16.msra.mxu1 %v2507_v62  ;;  %2273 = vmatpush1.bf16.msra.mxu0 %v2509_v2  ;;  %v2493_v62 = vcombine.low %v1368_v34, %v1372_v49  ;;  %v2486_v2 = vcombine.high %v1360_v58, %v1364_v59  ;;  %v1431_v34 = vld [vmem:[%s3878_s5 + $0x350] sm:$0xff] }
 0x25f   :  { %2221 = vmatprep.subr.bf16.mxu1 %v2500_v29  ;;  %2274 = vmatprep.subr.bf16.mxu0 %v2502_v30  ;;  %v2571_v29 = vcombine.low %v1447_v7, %v1451_v22  ;;  %v2573_v30 = vcombine.low %v1448_v9, %v1452_v44  ;;  %v1435_v49 = vld [vmem:[%s3878_s5 + $0x370] sm:$0xff]  ;;  %v2516_v22 = vcombine.high %v1391_v4, %v1395_v19 }
 0x260   :  { %v2556_v41 = vcombine.high %v1431_v34, %v1435_v49  ;;  %v1423_v58 = vld [vmem:[%s3878_s5 + $0x310] sm:$0xff]  ;;  %v2515_v44 = vcombine.low %v1391_v4, %v1395_v19 }
 0x261   :  { %v1427_v59 = vld [vmem:[%s3878_s5 + $0x330] sm:$0xff] }
 0x262   :  { %2222 = vmatpush1.bf16.msra.mxu1 %v2499_v55  ;;  %2275 = vmatpush1.bf16.msra.mxu0 %v2501_v37  ;;  %v1432_v55 = vld [vmem:[%s3878_s5 + $0x358] sm:$0xff]  ;;  %v2548_v45 = vcombine.high %v1423_v58, %v1427_v59 }
 0x263   :  { %2223 = vmatprep.subr.bf16.mxu1 %v2492_v38  ;;  %2276 = vmatprep.subr.bf16.mxu0 %v2494_v57  ;;  %v1436_v37 = vld [vmem:[%s3878_s5 + $0x378] sm:$0xff]  ;;  %v2563_v38 = vcombine.low %v1439_v63, %v1443_v26  ;;  %v2565_v57 = vcombine.low %v1440_v17, %v1444_v8 }
 0x264   :  { %v2558_v43 = vcombine.high %v1432_v55, %v1436_v37 }
 0x266   :  { %2224 = vmatpush1.bf16.msra.mxu1 %v2491_v31  ;;  %2277 = vmatpush1.bf16.msra.mxu0 %v2493_v62  ;;  %v1424_v31 = vld [vmem:[%s3878_s5 + $0x318] sm:$0xff] }
 0x267   :  { %2225 = vmatprep.subr.bf16.mxu1 %v2484_v0  ;;  %2278 = vmatprep.subr.bf16.mxu0 %v2486_v2  ;;  %v1428_v62 = vld [vmem:[%s3878_s5 + $0x338] sm:$0xff]  ;;  %v2555_v0 = vcombine.low %v1431_v34, %v1435_v49  ;;  %v2557_v2 = vcombine.low %v1432_v55, %v1436_v37 }
 0x268   :  { %v2550_v3 = vcombine.high %v1424_v31, %v1428_v62 }
 0x26a   :  { %2226 = vmatpush1.bf16.msra.mxu1 %v2483_v51  ;;  %2279 = vmatpush1.bf16.msra.mxu0 %v2485_v47  ;;  %v1416_v51 = vld [vmem:[%s3878_s5 + $0x2d8] sm:$0xff] }
 0x26b   :  { %2227 = vmatprep.subr.bf16.mxu1 %v2476_v56  ;;  %2280 = vmatprep.subr.bf16.mxu0 %v2478_v53  ;;  %v1420_v47 = vld [vmem:[%s3878_s5 + $0x2f8] sm:$0xff]  ;;  %v2547_v56 = vcombine.low %v1423_v58, %v1427_v59  ;;  %v2549_v53 = vcombine.low %v1424_v31, %v1428_v62 }
 0x26c   :  { %v2542_v35 = vcombine.high %v1416_v51, %v1420_v47 }
 0x26e   :  { %2228 = vmatpush1.bf16.msra.mxu1 %v2475_v6  ;;  %2281 = vmatpush1.bf16.msra.mxu0 %v2477_v40  ;;  %v1408_v6 = vld [vmem:[%s3878_s5 + $0x298] sm:$0xff] }
 0x26f   :  { %2229 = vmatprep.subr.bf16.mxu1 %v2468_v5  ;;  %2282 = vmatprep.subr.bf16.mxu0 %v2470_v10  ;;  %v1412_v40 = vld [vmem:[%s3878_s5 + $0x2b8] sm:$0xff]  ;;  %v2539_v5 = vcombine.low %v1415_v39, %v1419_v50  ;;  %v2541_v10 = vcombine.low %v1416_v51, %v1420_v47 }
 0x270   :  { %v2534_v42 = vcombine.high %v1408_v6, %v1412_v40 }
 0x272   :  { %2230 = vmatpush1.bf16.msra.mxu1 %v2467_v36  ;;  %2283 = vmatpush1.bf16.msra.mxu0 %v2469_v60  ;;  %v1400_v36 = vld [vmem:[%s3878_s5 + $0x258] sm:$0xff] }
 0x273   :  { %2231 = vmatprep.subr.bf16.mxu1 %v2460_v14  ;;  %2284 = vmatprep.subr.bf16.mxu0 %v2462_v16  ;;  %v1404_v60 = vld [vmem:[%s3878_s5 + $0x278] sm:$0xff]  ;;  %v2531_v14 = vcombine.low %v1407_v61, %v1411_v1  ;;  %v2533_v16 = vcombine.low %v1408_v6, %v1412_v40 }
 0x274   :  { %v2526_v48 = vcombine.high %v1400_v36, %v1404_v60 }
 0x276   :  { %2232 = vmatpush1.bf16.msra.mxu1 %v2459_v20  ;;  %2285 = vmatpush1.bf16.msra.mxu0 %v2461_v52  ;;  %v1392_v20 = vld [vmem:[%s3878_s5 + $0x218] sm:$0xff] }
 0x277   :  { %2233 = vmatprep.subr.bf16.mxu1 %v2452_v46  ;;  %2286 = vmatprep.subr.bf16.mxu0 %v2454_v21  ;;  %v1396_v52 = vld [vmem:[%s3878_s5 + $0x238] sm:$0xff]  ;;  %v2523_v46 = vcombine.low %v1399_v15, %v1403_v13  ;;  %v2525_v21 = vcombine.low %v1400_v36, %v1404_v60 }
 0x278   :  { %v2518_v9 = vcombine.high %v1392_v20, %v1396_v52 }
 0x27a   :  { %2234 = vmatpush1.bf16.msra.mxu1 %v2451_v12  ;;  %2287 = vmatpush1.bf16.msra.mxu0 %v2453_v23  ;;  %v2517_v12 = vcombine.low %v1392_v20, %v1396_v52 }
 0x27b   :  { %2235 = vmatprep.subr.bf16.mxu1 %v2572_v24  ;;  %2288 = vmatprep.subr.bf16.mxu0 %v2574_v25 }
 0x27e   :  { %2236 = vmatpush2.bf16.msra.mxu1 %v2571_v29  ;;  %2289 = vmatpush2.bf16.msra.mxu0 %v2573_v30 }
 0x27f   :  { %2237 = vmatprep.subr.bf16.mxu1 %v2564_v32  ;;  %2290 = vmatprep.subr.bf16.mxu0 %v2566_v33 }
 0x282   :  { %2238 = vmatpush2.bf16.msra.mxu1 %v2563_v38  ;;  %2291 = vmatpush2.bf16.msra.mxu0 %v2565_v57 }
 0x283   :  { %2239 = vmatprep.subr.bf16.mxu1 %v2556_v41  ;;  %2292 = vmatprep.subr.bf16.mxu0 %v2558_v43 }
 0x286   :  { %2240 = vmatpush2.bf16.msra.mxu1 %v2555_v0  ;;  %2293 = vmatpush2.bf16.msra.mxu0 %v2557_v2 }
 0x287   :  { %2241 = vmatprep.subr.bf16.mxu1 %v2548_v45  ;;  %2294 = vmatprep.subr.bf16.mxu0 %v2550_v3 }
 0x28a   :  { %2242 = vmatpush2.bf16.msra.mxu1 %v2547_v56  ;;  %2295 = vmatpush2.bf16.msra.mxu0 %v2549_v53 }
 0x28b   :  { %2243 = vmatprep.subr.bf16.mxu1 %v2540_v54  ;;  %2296 = vmatprep.subr.bf16.mxu0 %v2542_v35 }
 0x28e   :  { %2244 = vmatpush2.bf16.msra.mxu1 %v2539_v5  ;;  %2297 = vmatpush2.bf16.msra.mxu0 %v2541_v10 }
 0x28f   :  { %2245 = vmatprep.subr.bf16.mxu1 %v2532_v11  ;;  %2298 = vmatprep.subr.bf16.mxu0 %v2534_v42 }
 0x292   :  { %2246 = vmatpush2.bf16.msra.mxu1 %v2531_v14  ;;  %2299 = vmatpush2.bf16.msra.mxu0 %v2533_v16 }
 0x293   :  { %v2885_v7 = vpop.trf.xlu1  ;;  %2247 = vmatprep.subr.bf16.mxu1 %v2524_v18  ;;  %2300 = vmatprep.subr.bf16.mxu0 %v2526_v48 }
 0x294   :  { %v2889_v23 = vunpack.i.h.bf16 %v2885_v7  ;;  %v2886_v24 = vunpack.i.l.bf16 %v2885_v7 }
 0x296   :  { %2248 = vmatpush2.bf16.msra.mxu1 %v2523_v46  ;;  %2301 = vmatpush2.bf16.msra.mxu0 %v2525_v21 }
 0x297   :  { %v2890_v25 = vpop.trf.xlu1  ;;  %2249 = vmatprep.subr.bf16.mxu1 %v2516_v22  ;;  %2302 = vmatprep.subr.bf16.mxu0 %v2518_v9 }
 0x298   :  { %v2894_v63 = vunpack.i.h.bf16 %v2890_v25  ;;  %v2891_v26 = vunpack.i.l.bf16 %v2890_v25 }
 0x29a   :  { %v2581_v17 = vpack.c.bf16 %v2894_v63, %v2889_v23  ;;  %v2582_v8 = vpack.c.bf16 %v2891_v26, %v2886_v24  ;;  %2250 = vmatpush2.bf16.msra.mxu1 %v2515_v44  ;;  %2303 = vmatpush2.bf16.msra.mxu0 %v2517_v12 }
 0x29c   :  { %2155 = vmatprep.mubr.bf16.mxu1 %v2582_v8  ;;  %2208 = vmatprep.mubr.bf16.mxu0 %v2582_v8 }
 0x29d   :  { %2156 = vmatmul.mubr.bf16.gmra.mxu1 %v2581_v17  ;;  %2209 = vmatmul.mubr.bf16.gmra.mxu0 %v2581_v17 }
 0x29e   :  { %2251 = vmatprep.mubr.bf16.mxu1 %v3594_v28  ;;  %2304 = vmatprep.mubr.bf16.mxu0 %v3594_v28 }
 0x2a5   :  { %2252 = vmatmul.mubr.bf16.vlgmr.msra.gmra.mxu1 %v3592_v27  ;;  %2305 = vmatmul.mubr.bf16.vlgmr.msra.gmra.mxu0 %v3592_v27 }
 0x2a6   :  { %2261 = vmatprep.mubr.bf16.mxu1 %v2582_v8  ;;  %2314 = vmatprep.mubr.bf16.mxu0 %v2582_v8 }
 0x2ad   :  { %2262 = vmatmul.mubr.bf16.gmra.mxu1 %v2581_v17  ;;  %2315 = vmatmul.mubr.bf16.gmra.mxu0 %v2581_v17 }
 0x31d   :  { %v2147_v29 = vpop.f32.mrf.mxu1  ;;  %v2200_v30 = vpop.f32.mrf.mxu0 }
 0x31e   :  { %2325 = vst [vmem:[%s3880_s6] sm:$0xff] %v2147_v29  ;;  %2327 = vst [vmem:[%s3880_s6 + $0x10] sm:$0xff] %v2200_v30 }
 0x31f   :  { %v2149_v32 = vpop.f32.mrf.mxu1  ;;  %v2202_v28 = vpop.f32.mrf.mxu0 }
 0x320   :  { %2326 = vst [vmem:[%s3880_s6 + $0x8] sm:$0xff] %v2149_v32  ;;  %2328 = vst [vmem:[%s3880_s6 + $0x18] sm:$0xff] %v2202_v28 }
 0x321   :  { %v2151_v27 = vpop.f32.mrf.mxu1  ;;  %v2204_v33 = vpop.f32.mrf.mxu0 }
 0x322   :  { %2333 = vst [vmem:[%s3880_s6 + $0x40] sm:$0xff] %v2151_v27  ;;  %2335 = vst [vmem:[%s3880_s6 + $0x50] sm:$0xff] %v2204_v33 }
 0x323   :  { %v2153_v34 = vpop.f32.mrf.mxu1  ;;  %v2206_v49 = vpop.f32.mrf.mxu0 }
 0x324   :  { %2334 = vst [vmem:[%s3880_s6 + $0x48] sm:$0xff] %v2153_v34  ;;  %2336 = vst [vmem:[%s3880_s6 + $0x58] sm:$0xff] %v2206_v49 }
 0x35d   :  { %v2157_v55 = vpop.f32.mrf.mxu1  ;;  %v2210_v37 = vpop.f32.mrf.mxu0 }
 0x35e   :  { %2341 = vst [vmem:[%s3880_s6 + $0x80] sm:$0xff] %v2157_v55  ;;  %2343 = vst [vmem:[%s3880_s6 + $0x90] sm:$0xff] %v2210_v37 }
 0x35f   :  { %v2159_v38 = vpop.f32.mrf.mxu1  ;;  %v2212_v57 = vpop.f32.mrf.mxu0 }
 0x360   :  { %2342 = vst [vmem:[%s3880_s6 + $0x88] sm:$0xff] %v2159_v38  ;;  %2344 = vst [vmem:[%s3880_s6 + $0x98] sm:$0xff] %v2212_v57 }
 0x361   :  { %v2161_v41 = vpop.f32.mrf.mxu1  ;;  %v2214_v43 = vpop.f32.mrf.mxu0 }
 0x362   :  { %2349 = vst [vmem:[%s3880_s6 + $0xc0] sm:$0xff] %v2161_v41  ;;  %2351 = vst [vmem:[%s3880_s6 + $0xd0] sm:$0xff] %v2214_v43 }
 0x363   :  { %v2163_v58 = vpop.f32.mrf.mxu1  ;;  %v2216_v59 = vpop.f32.mrf.mxu0 }
 0x364   :  { %2350 = vst [vmem:[%s3880_s6 + $0xc8] sm:$0xff] %v2163_v58  ;;  %2352 = vst [vmem:[%s3880_s6 + $0xd8] sm:$0xff] %v2216_v59 }
 0x365   :  { %v2253_v31 = vpop.f32.mrf.mxu1  ;;  %v2306_v62 = vpop.f32.mrf.mxu0 }
 0x366   :  { %2329 = vst [vmem:[%s3880_s6 + $0x20] sm:$0xff] %v2253_v31  ;;  %2331 = vst [vmem:[%s3880_s6 + $0x30] sm:$0xff] %v2306_v62 }
 0x367   :  { %v2255_v0 = vpop.f32.mrf.mxu1  ;;  %v2308_v2 = vpop.f32.mrf.mxu0 }
 0x368   :  { %2330 = vst [vmem:[%s3880_s6 + $0x28] sm:$0xff] %v2255_v0  ;;  %2332 = vst [vmem:[%s3880_s6 + $0x38] sm:$0xff] %v2308_v2 }
 0x369   :  { %v2257_v45 = vpop.f32.mrf.mxu1  ;;  %v2310_v3 = vpop.f32.mrf.mxu0 }
 0x36a   :  { %2337 = vst [vmem:[%s3880_s6 + $0x60] sm:$0xff] %v2257_v45  ;;  %2339 = vst [vmem:[%s3880_s6 + $0x70] sm:$0xff] %v2310_v3 }
 0x36b   :  { %v2259_v39 = vpop.f32.mrf.mxu1  ;;  %v2312_v50 = vpop.f32.mrf.mxu0 }
 0x36c   :  { %2338 = vst [vmem:[%s3880_s6 + $0x68] sm:$0xff] %v2259_v39  ;;  %2340 = vst [vmem:[%s3880_s6 + $0x78] sm:$0xff] %v2312_v50 }
 0x36d   :  { %v2263_v51 = vpop.f32.mrf.mxu1  ;;  %v2316_v47 = vpop.f32.mrf.mxu0 }
 0x36e   :  { %2345 = vst [vmem:[%s3880_s6 + $0xa0] sm:$0xff] %v2263_v51  ;;  %2347 = vst [vmem:[%s3880_s6 + $0xb0] sm:$0xff] %v2316_v47 }
 0x36f   :  { %v2265_v56 = vpop.f32.mrf.mxu1  ;;  %v2318_v53 = vpop.f32.mrf.mxu0 }
 0x370   :  { %2346 = vst [vmem:[%s3880_s6 + $0xa8] sm:$0xff] %v2265_v56  ;;  %2348 = vst [vmem:[%s3880_s6 + $0xb8] sm:$0xff] %v2318_v53 }
 0x371   :  { %v2267_v54 = vpop.f32.mrf.mxu1  ;;  %v2320_v35 = vpop.f32.mrf.mxu0 }
 0x372   :  { %2353 = vst [vmem:[%s3880_s6 + $0xe0] sm:$0xff] %v2267_v54  ;;  %2355 = vst [vmem:[%s3880_s6 + $0xf0] sm:$0xff] %v2320_v35 }
 0x373   :  { %v2269_v61 = vpop.f32.mrf.mxu1  ;;  %v2322_v1 = vpop.f32.mrf.mxu0 }
 0x374   :  { %2354 = vst [vmem:[%s3880_s6 + $0xe8] sm:$0xff] %v2269_v61  ;;  %2356 = vst [vmem:[%s3880_s6 + $0xf8] sm:$0xff] %v2322_v1 }

</bundles_post_ra>
